<compile_context>
chip_gen: v7x
topology: tpu7x:2x2x1
jax: 0.10.0
libtpu: 0.0.40
codegen_flags: <defaults>
</compile_context>

<pallas_src>
import functools

import jax
import jax.numpy as jnp
from jax.experimental import pallas as pl
from jax.experimental.pallas import tpu as pltpu


# ----------------------------------------------------------------------------
# Pallas kernel: one bidirectional GRU layer, grid=(2,) over direction.
# PyTorch gate order (r, z, n); weights stored transposed (H, 3H).
# ----------------------------------------------------------------------------
def _make_bigru_kernel(T, B, H):
    def kernel(len_ref, gi_ref, whh_ref, bhhn_ref, out_ref, hlast_ref):
        d = pl.program_id(0)                  # 0 = forward, 1 = backward
        lens = len_ref[...]                   # (B, 1) int32, loaded once
        whh = whh_ref[...]                    # (H, 3H)
        bhh_n = bhhn_ref[...]                 # (1, H) — only the n-gate b_hh stays in-loop

        def body(s, h):
            # actual timestep handled by this iteration (reversed for d == 1)
            t = jnp.where(d == 0, s, T - 1 - s)
            gi = gi_ref[t]                    # (B, 3H) precomputed input projection
            gh = jnp.dot(h, whh, preferred_element_type=jnp.float32)   # (B, 3H)
            r = jax.nn.sigmoid(gi[:, 0 * H:1 * H] + gh[:, 0 * H:1 * H])
            z = jax.nn.sigmoid(gi[:, 1 * H:2 * H] + gh[:, 1 * H:2 * H])
            n = jnp.tanh(gi[:, 2 * H:3 * H] + r * (gh[:, 2 * H:3 * H] + bhh_n))
            h_new = (1.0 - z) * n + z * h
            # packed-sequence semantics: state frozen on padding positions
            valid = lens > t                  # (B, 1) bool
            h_upd = jnp.where(valid, h_new, h)
            out_ref[t] = jnp.where(valid, h_upd, 0.0)   # VMEM-resident; DMA'd out once
            return h_upd

        h_last = jax.lax.fori_loop(0, T, body, jnp.zeros((B, H), jnp.float32),
                                   unroll=True)
        hlast_ref[...] = h_last               # written once, after the loop

    return kernel


def gru_bidir_layer(gi_stacked, whh_stacked, bhhn_stacked, len2d):
    """gi_stacked: (2, T, B, 3H).  Returns out (2, T, B, H), h_last (2, B, H)."""
    _, T, B, H3 = gi_stacked.shape
    H = H3 // 3
    out, hlast = pl.pallas_call(
        _make_bigru_kernel(T, B, H),
        out_shape=(jax.ShapeDtypeStruct((2, T, B, H), jnp.float32),
                   jax.ShapeDtypeStruct((2, B, H), jnp.float32)),
        grid=(2,),
        in_specs=[
            pl.BlockSpec((B, 1), lambda d: (0, 0)),                      # lengths
            pl.BlockSpec((None, T, B, 3 * H), lambda d: (d, 0, 0, 0)),   # gi (per dir)
            pl.BlockSpec((None, H, 3 * H), lambda d: (d, 0, 0)),         # W_hh (per dir)
            pl.BlockSpec((None, 1, H), lambda d: (d, 0, 0)),             # b_hh (n gate)
        ],
        out_specs=(
            pl.BlockSpec((None, T, B, H), lambda d: (d, 0, 0, 0)),       # seq outputs
            pl.BlockSpec((None, B, H), lambda d: (d, 0, 0)),             # last states
        ),
        compiler_params=pltpu.CompilerParams(dimension_semantics=("parallel",)),
    )(len2d, gi_stacked, whh_stacked, bhhn_stacked)
    return out, hlast


# ----------------------------------------------------------------------------
# InstructionEmbedding forward
# ----------------------------------------------------------------------------
def instruction_embedding_forward(params, sent, sent_length, *, nlayers, hidden_dim):
    B, T = sent.shape
    H = hidden_dim

    # word embedding (padding_idx=0 -> row 0 is zeros)
    word = params["word_emb"][sent]                                   # (B, T, Dw)
    # TODO(synk): exact LearnedPositionalEmbedding definition not provided;
    # implemented as a plain learned lookup over absolute positions 0..T-1.
    pos = params["pos_emb"][jnp.arange(T)]                            # (T, Dp)
    pos = jnp.broadcast_to(pos[None], (B, T, pos.shape[-1]))
    f = jnp.concatenate([word, pos], axis=-1).astype(jnp.float32)     # (B, T, E)
    x_tbe = jnp.transpose(f, (1, 0, 2))                               # (T, B, E), once

    len2d = sent_length.reshape(B, 1).astype(jnp.int32)

    last_states = []
    prev_out = None                         # (2, T, B, H): [fwd, bwd] sequence outputs
    for layer in range(nlayers):
        gi_dirs, whh_dirs, bhhn_dirs = [], [], []
        for direction in range(2):
            wih, whh, bih, bhh = params["gru"][layer][direction]
            # fold b_ih plus the r/z parts of b_hh into the precomputed projection;
            # the n-gate b_hh must stay in-loop (it is multiplied by r).
            bias = bih + jnp.concatenate([bhh[:2 * H], jnp.zeros((H,), jnp.float32)])
            if layer == 0:
                gi = jnp.einsum("tbe,eh->tbh", x_tbe, wih) + bias
            else:
                # consume fwd/bwd slabs directly by splitting W_ih -> no concat needed
                gi = (jnp.einsum("tbh,hk->tbk", prev_out[0], wih[:H]) +
                      jnp.einsum("tbh,hk->tbk", prev_out[1], wih[H:]) + bias)
            gi_dirs.append(gi)
            whh_dirs.append(whh)
            bhhn_dirs.append(bhh[2 * H:].reshape(1, H))

        gi_stacked = jnp.stack(gi_dirs, axis=0)                       # (2, T, B, 3H)
        whh_stacked = jnp.stack(whh_dirs, axis=0)                     # (2, H, 3H)
        bhhn_stacked = jnp.stack(bhhn_dirs, axis=0)                   # (2, 1, H)

        prev_out, hlast = gru_bidir_layer(gi_stacked, whh_stacked, bhhn_stacked, len2d)
        last_states.append(hlast)

    return jnp.concatenate(last_states, axis=0)                       # (2*nlayers, B, H)


# ----------------------------------------------------------------------------
# Pure-JAX reference (lax.scan) to validate the Pallas recurrence.
# ----------------------------------------------------------------------------
def _ref_gru_layer(x_bte, lengths, wih, whh, bih, bhh, H, reverse):
    B, T, E = x_bte.shape

    def step(h, inputs):
        x, t = inputs
        gi = x @ wih + bih
        gh = h @ whh + bhh
        r = jax.nn.sigmoid(gi[:, :H] + gh[:, :H])
        z = jax.nn.sigmoid(gi[:, H:2 * H] + gh[:, H:2 * H])
        n = jnp.tanh(gi[:, 2 * H:] + r * gh[:, 2 * H:])
        h_new = (1.0 - z) * n + z * h
        valid = (lengths[:, None] > t)
        h_upd = jnp.where(valid, h_new, h)
        return h_upd, jnp.where(valid, h_upd, 0.0)

    ts = jnp.arange(T)
    xs = jnp.transpose(x_bte, (1, 0, 2))
    if reverse:
        ts = ts[::-1]
        xs = xs[::-1]
    h0 = jnp.zeros((B, H), jnp.float32)
    h_last, outs = jax.lax.scan(step, h0, (xs, ts))
    if reverse:
        outs = outs[::-1]
    return jnp.transpose(outs, (1, 0, 2)), h_last


def _ref_forward(params, sent, sent_length, *, nlayers, hidden_dim):
    B, T = sent.shape
    word = params["word_emb"][sent]
    pos = params["pos_emb"][jnp.arange(T)]
    pos = jnp.broadcast_to(pos[None], (B, T, pos.shape[-1]))
    inp = jnp.concatenate([word, pos], axis=-1).astype(jnp.float32)
    lengths = sent_length.astype(jnp.int32)
    last_states = []
    for layer in range(nlayers):
        outs = []
        for direction in range(2):
            wih, whh, bih, bhh = params["gru"][layer][direction]
            o, h = _ref_gru_layer(inp, lengths, wih, whh, bih, bhh, hidden_dim,
                                  reverse=(direction == 1))
            outs.append(o)
            last_states.append(h)
        inp = jnp.concatenate(outs, axis=-1)
    return jnp.stack(last_states, axis=0)


# ----------------------------------------------------------------------------
# Deterministic parameter init + demo
# ----------------------------------------------------------------------------
def init_params(key, vocab_size, word_dim, pos_dim, hidden_dim, nlayers):
    keys = jax.random.split(key, 2 + 8 * nlayers)
    word_emb = 0.1 * jax.random.normal(keys[0], (vocab_size, word_dim), jnp.float32)
    word_emb = word_emb.at[0].set(0.0)                    # padding_idx=0
    pos_emb = 0.1 * jax.random.normal(keys[1], (128, pos_dim), jnp.float32)

    E0 = word_dim + pos_dim
    gru = []
    k = 2
    for layer in range(nlayers):
        in_dim = E0 if layer == 0 else 2 * hidden_dim
        dirs = []
        for _direction in range(2):
            wih = 0.1 * jax.random.normal(keys[k], (in_dim, 3 * hidden_dim), jnp.float32); k += 1
            whh = 0.1 * jax.random.normal(keys[k], (hidden_dim, 3 * hidden_dim), jnp.float32); k += 1
            bih = 0.1 * jax.random.normal(keys[k], (3 * hidden_dim,), jnp.float32); k += 1
            bhh = 0.1 * jax.random.normal(keys[k], (3 * hidden_dim,), jnp.float32); k += 1
            dirs.append((wih, whh, bih, bhh))
        gru.append(dirs)
    return {"word_emb": word_emb, "pos_emb": pos_emb, "gru": gru}


if __name__ == "__main__":
    # small config: len(vocab)=50, gru_hidden_dim=32, gru_nlayers=2,
    # word_emb_dim=16, positional_emb_dim=8  ->  total_embedding_dim=24
    VOCAB, WORD_D, POS_D, HID, NLAYERS = 50, 16, 8, 32, 2
    B, T = 2, 8

    key = jax.random.PRNGKey(0)
    kp, ks = jax.random.split(key)
    params = init_params(kp, VOCAB, WORD_D, POS_D, HID, NLAYERS)

    sent = jax.random.randint(ks, (B, T), 1, VOCAB).astype(jnp.int32)
    sent_length = jnp.array([8, 5], dtype=jnp.int32)
    # zero-pad beyond each length (padding token id 0)
    pad_mask = jnp.arange(T)[None, :] < sent_length[:, None]
    sent = jnp.where(pad_mask, sent, 0)

    fwd = jax.jit(functools.partial(instruction_embedding_forward,
                                    nlayers=NLAYERS, hidden_dim=HID))
    last_state = fwd(params, sent, sent_length)
    last_state = jax.block_until_ready(last_state)

    ref = _ref_forward(params, sent, sent_length, nlayers=NLAYERS, hidden_dim=HID)
    assert last_state.shape == (2 * NLAYERS, B, HID)
    assert jnp.allclose(last_state, ref, atol=2e-3, rtol=2e-3)

    print("KERNEL_OK")
</pallas_src>

<mosaic_0001>
module attributes {stable_mosaic.version = 11 : i64} {
  func.func @kernel(%arg0: i32, %arg1: memref<2x1xi32, #tpu.memory_space<vmem>>, %arg2: memref<1x8x2x96xf32, #tpu.memory_space<vmem>>, %arg3: memref<1x32x96xf32, #tpu.memory_space<vmem>>, %arg4: memref<1x1x32xf32, #tpu.memory_space<vmem>>, %arg5: memref<1x8x2x32xf32, #tpu.memory_space<vmem>>, %arg6: memref<1x2x32xf32, #tpu.memory_space<vmem>>) attributes {dimension_semantics = [#tpu.dimension_semantics<parallel>], iteration_bounds = array<i64: 2>, scalar_prefetch = 0 : i64, scratch_operands = 0 : i64, tpu.core_type = #tpu.core_type<tc>, window_params = [{pipeline_mode = #tpu.pipeline_mode<synchronous>, transform_indices = @transform_0, window_bounds = array<i64: 2, 1>}, {transform_indices = @transform_1, window_bounds = array<i64: 1, 8, 2, 96>}, {transform_indices = @transform_2, window_bounds = array<i64: 1, 32, 96>}, {transform_indices = @transform_3, window_bounds = array<i64: 1, 1, 32>}, {transform_indices = @transform_4, window_bounds = array<i64: 1, 8, 2, 32>}, {transform_indices = @transform_5, window_bounds = array<i64: 1, 2, 32>}]} {
    %c0 = arith.constant 0 : index
    %c0_0 = arith.constant 0 : index
    %0 = vector.load %arg1[%c0, %c0_0] : memref<2x1xi32, #tpu.memory_space<vmem>>, vector<2x1xi32>
    %c0_1 = arith.constant 0 : index
    %c0_2 = arith.constant 0 : index
    %c0_3 = arith.constant 0 : index
    %1 = vector.load %arg3[%c0_1, %c0_2, %c0_3] : memref<1x32x96xf32, #tpu.memory_space<vmem>>, vector<1x32x96xf32>
    %2 = vector.shape_cast %1 : vector<1x32x96xf32> to vector<32x96xf32>
    %c0_4 = arith.constant 0 : index
    %c0_5 = arith.constant 0 : index
    %c0_6 = arith.constant 0 : index
    %3 = vector.load %arg4[%c0_4, %c0_5, %c0_6] : memref<1x1x32xf32, #tpu.memory_space<vmem>>, vector<1x1x32xf32>
    %4 = vector.shape_cast %3 : vector<1x1x32xf32> to vector<1x32xf32>
    %cst = arith.constant 0.000000e+00 : f32
    %5 = vector.broadcast %cst : f32 to vector<2x32xf32>
    %c0_i32 = arith.constant 0 : i32
    %c0_i32_7 = arith.constant 0 : i32
    %6 = arith.cmpi eq, %arg0, %c0_i32_7 : i32
    %c7_i32 = arith.constant 7 : i32
    %7 = arith.subi %c7_i32, %c0_i32 : i32
    %8 = arith.select %6, %c0_i32, %7 : i32
    %c0_8 = arith.constant 0 : index
    %9 = arith.index_cast %8 : i32 to index
    %c0_9 = arith.constant 0 : index
    %c0_10 = arith.constant 0 : index
    %10 = vector.load %arg2[%c0_8, %9, %c0_9, %c0_10] : memref<1x8x2x96xf32, #tpu.memory_space<vmem>>, vector<1x1x2x96xf32>
    %11 = vector.shape_cast %10 : vector<1x1x2x96xf32> to vector<2x96xf32>
    %cst_11 = arith.constant dense<0.000000e+00> : vector<2x96xf32>
    %12 = tpu.matmul %5, %2, %cst_11 {dimension_numbers = #tpu.dot_dimension_numbers<[1], [0], [0], [1], [0, 0, 1, 1], [], []>} : vector<2x32xf32>, vector<32x96xf32>, vector<2x96xf32> -> vector<2x96xf32>
    %13 = vector.extract_strided_slice %11 {offsets = [0, 0], sizes = [2, 32], strides = [1, 1]} : vector<2x96xf32> to vector<2x32xf32>
    %14 = vector.extract_strided_slice %12 {offsets = [0, 0], sizes = [2, 32], strides = [1, 1]} : vector<2x96xf32> to vector<2x32xf32>
    %15 = arith.addf %13, %14 : vector<2x32xf32>
    %16 = arith.negf %15 : vector<2x32xf32>
    %17 = math.exp %16 : vector<2x32xf32>
    %cst_12 = arith.constant 1.000000e+00 : f32
    %18 = vector.broadcast %cst_12 : f32 to vector<2x32xf32>
    %19 = arith.addf %18, %17 : vector<2x32xf32>
    %20 = arith.divf %18, %19 : vector<2x32xf32>
    %21 = vector.extract_strided_slice %11 {offsets = [0, 32], sizes = [2, 32], strides = [1, 1]} : vector<2x96xf32> to vector<2x32xf32>
    %22 = vector.extract_strided_slice %12 {offsets = [0, 32], sizes = [2, 32], strides = [1, 1]} : vector<2x96xf32> to vector<2x32xf32>
    %23 = arith.addf %21, %22 : vector<2x32xf32>
    %24 = arith.negf %23 : vector<2x32xf32>
    %25 = math.exp %24 : vector<2x32xf32>
    %cst_13 = arith.constant 1.000000e+00 : f32
    %26 = vector.broadcast %cst_13 : f32 to vector<2x32xf32>
    %27 = arith.addf %26, %25 : vector<2x32xf32>
    %28 = arith.divf %26, %27 : vector<2x32xf32>
    %29 = vector.extract_strided_slice %11 {offsets = [0, 64], sizes = [2, 32], strides = [1, 1]} : vector<2x96xf32> to vector<2x32xf32>
    %30 = vector.extract_strided_slice %12 {offsets = [0, 64], sizes = [2, 32], strides = [1, 1]} : vector<2x96xf32> to vector<2x32xf32>
    %31 = vector.broadcast %4 : vector<1x32xf32> to vector<2x32xf32>
    %32 = arith.addf %30, %31 : vector<2x32xf32>
    %33 = arith.mulf %20, %32 : vector<2x32xf32>
    %34 = arith.addf %29, %33 : vector<2x32xf32>
    %35 = math.tanh %34 : vector<2x32xf32>
    %cst_14 = arith.constant 1.000000e+00 : f32
    %36 = vector.broadcast %cst_14 : f32 to vector<2x32xf32>
    %37 = arith.subf %36, %28 : vector<2x32xf32>
    %38 = arith.mulf %37, %35 : vector<2x32xf32>
    %39 = arith.mulf %28, %5 : vector<2x32xf32>
    %40 = arith.addf %38, %39 : vector<2x32xf32>
    %41 = vector.broadcast %8 : i32 to vector<2x1xi32>
    %42 = arith.cmpi sgt, %0, %41 : vector<2x1xi32>
    %43 = vector.shape_cast %42 : vector<2x1xi1> to vector<2x1xi1>
    %44 = vector.broadcast %43 : vector<2x1xi1> to vector<2x32xi1>
    %45 = arith.select %44, %40, %5 : vector<2x32xi1>, vector<2x32xf32>
    %cst_15 = arith.constant 0.000000e+00 : f32
    %46 = vector.shape_cast %42 : vector<2x1xi1> to vector<2x1xi1>
    %47 = vector.broadcast %46 : vector<2x1xi1> to vector<2x32xi1>
    %48 = vector.broadcast %cst_15 : f32 to vector<2x32xf32>
    %49 = arith.select %47, %45, %48 : vector<2x32xi1>, vector<2x32xf32>
    %c0_16 = arith.constant 0 : index
    %50 = arith.index_cast %8 : i32 to index
    %c0_17 = arith.constant 0 : index
    %c0_18 = arith.constant 0 : index
    %51 = vector.load %arg5[%c0_16, %50, %c0_17, %c0_18] : memref<1x8x2x32xf32, #tpu.memory_space<vmem>>, vector<1x1x2x32xf32>
    %52 = vector.shape_cast %51 : vector<1x1x2x32xf32> to vector<2x32xf32>
    %53 = vector.shape_cast %49 : vector<2x32xf32> to vector<1x1x2x32xf32>
    tpu.vector_store %arg5[%c0_16, %50, %c0_17, %c0_18], %53 {strides = array<i32>} : memref<1x8x2x32xf32, #tpu.memory_space<vmem>>, vector<1x1x2x32xf32>,
    %c1_i32 = arith.constant 1 : i32
    %c0_i32_19 = arith.constant 0 : i32
    %54 = arith.cmpi eq, %arg0, %c0_i32_19 : i32
    %c7_i32_20 = arith.constant 7 : i32
    %55 = arith.subi %c7_i32_20, %c1_i32 : i32
    %56 = arith.select %54, %c1_i32, %55 : i32
    %c0_21 = arith.constant 0 : index
    %57 = arith.index_cast %56 : i32 to index
    %c0_22 = arith.constant 0 : index
    %c0_23 = arith.constant 0 : index
    %58 = vector.load %arg2[%c0_21, %57, %c0_22, %c0_23] : memref<1x8x2x96xf32, #tpu.memory_space<vmem>>, vector<1x1x2x96xf32>
    %59 = vector.shape_cast %58 : vector<1x1x2x96xf32> to vector<2x96xf32>
    %cst_24 = arith.constant dense<0.000000e+00> : vector<2x96xf32>
    %60 = tpu.matmul %45, %2, %cst_24 {dimension_numbers = #tpu.dot_dimension_numbers<[1], [0], [0], [1], [0, 0, 1, 1], [], []>} : vector<2x32xf32>, vector<32x96xf32>, vector<2x96xf32> -> vector<2x96xf32>
    %61 = vector.extract_strided_slice %59 {offsets = [0, 0], sizes = [2, 32], strides = [1, 1]} : vector<2x96xf32> to vector<2x32xf32>
    %62 = vector.extract_strided_slice %60 {offsets = [0, 0], sizes = [2, 32], strides = [1, 1]} : vector<2x96xf32> to vector<2x32xf32>
    %63 = arith.addf %61, %62 : vector<2x32xf32>
    %64 = arith.negf %63 : vector<2x32xf32>
    %65 = math.exp %64 : vector<2x32xf32>
    %cst_25 = arith.constant 1.000000e+00 : f32
    %66 = vector.broadcast %cst_25 : f32 to vector<2x32xf32>
    %67 = arith.addf %66, %65 : vector<2x32xf32>
    %68 = arith.divf %66, %67 : vector<2x32xf32>
    %69 = vector.extract_strided_slice %59 {offsets = [0, 32], sizes = [2, 32], strides = [1, 1]} : vector<2x96xf32> to vector<2x32xf32>
    %70 = vector.extract_strided_slice %60 {offsets = [0, 32], sizes = [2, 32], strides = [1, 1]} : vector<2x96xf32> to vector<2x32xf32>
    %71 = arith.addf %69, %70 : vector<2x32xf32>
    %72 = arith.negf %71 : vector<2x32xf32>
    %73 = math.exp %72 : vector<2x32xf32>
    %cst_26 = arith.constant 1.000000e+00 : f32
    %74 = vector.broadcast %cst_26 : f32 to vector<2x32xf32>
    %75 = arith.addf %74, %73 : vector<2x32xf32>
    %76 = arith.divf %74, %75 : vector<2x32xf32>
    %77 = vector.extract_strided_slice %59 {offsets = [0, 64], sizes = [2, 32], strides = [1, 1]} : vector<2x96xf32> to vector<2x32xf32>
    %78 = vector.extract_strided_slice %60 {offsets = [0, 64], sizes = [2, 32], strides = [1, 1]} : vector<2x96xf32> to vector<2x32xf32>
    %79 = vector.broadcast %4 : vector<1x32xf32> to vector<2x32xf32>
    %80 = arith.addf %78, %79 : vector<2x32xf32>
    %81 = arith.mulf %68, %80 : vector<2x32xf32>
    %82 = arith.addf %77, %81 : vector<2x32xf32>
    %83 = math.tanh %82 : vector<2x32xf32>
    %cst_27 = arith.constant 1.000000e+00 : f32
    %84 = vector.broadcast %cst_27 : f32 to vector<2x32xf32>
    %85 = arith.subf %84, %76 : vector<2x32xf32>
    %86 = arith.mulf %85, %83 : vector<2x32xf32>
    %87 = arith.mulf %76, %45 : vector<2x32xf32>
    %88 = arith.addf %86, %87 : vector<2x32xf32>
    %89 = vector.broadcast %56 : i32 to vector<2x1xi32>
    %90 = arith.cmpi sgt, %0, %89 : vector<2x1xi32>
    %91 = vector.shape_cast %90 : vector<2x1xi1> to vector<2x1xi1>
    %92 = vector.broadcast %91 : vector<2x1xi1> to vector<2x32xi1>
    %93 = arith.select %92, %88, %45 : vector<2x32xi1>, vector<2x32xf32>
    %cst_28 = arith.constant 0.000000e+00 : f32
    %94 = vector.shape_cast %90 : vector<2x1xi1> to vector<2x1xi1>
    %95 = vector.broadcast %94 : vector<2x1xi1> to vector<2x32xi1>
    %96 = vector.broadcast %cst_28 : f32 to vector<2x32xf32>
    %97 = arith.select %95, %93, %96 : vector<2x32xi1>, vector<2x32xf32>
    %c0_29 = arith.constant 0 : index
    %98 = arith.index_cast %56 : i32 to index
    %c0_30 = arith.constant 0 : index
    %c0_31 = arith.constant 0 : index
    %99 = vector.load %arg5[%c0_29, %98, %c0_30, %c0_31] : memref<1x8x2x32xf32, #tpu.memory_space<vmem>>, vector<1x1x2x32xf32>
    %100 = vector.shape_cast %99 : vector<1x1x2x32xf32> to vector<2x32xf32>
    %101 = vector.shape_cast %97 : vector<2x32xf32> to vector<1x1x2x32xf32>
    tpu.vector_store %arg5[%c0_29, %98, %c0_30, %c0_31], %101 {strides = array<i32>} : memref<1x8x2x32xf32, #tpu.memory_space<vmem>>, vector<1x1x2x32xf32>,
    %c2_i32 = arith.constant 2 : i32
    %c0_i32_32 = arith.constant 0 : i32
    %102 = arith.cmpi eq, %arg0, %c0_i32_32 : i32
    %c7_i32_33 = arith.constant 7 : i32
    %103 = arith.subi %c7_i32_33, %c2_i32 : i32
    %104 = arith.select %102, %c2_i32, %103 : i32
    %c0_34 = arith.constant 0 : index
    %105 = arith.index_cast %104 : i32 to index
    %c0_35 = arith.constant 0 : index
    %c0_36 = arith.constant 0 : index
    %106 = vector.load %arg2[%c0_34, %105, %c0_35, %c0_36] : memref<1x8x2x96xf32, #tpu.memory_space<vmem>>, vector<1x1x2x96xf32>
    %107 = vector.shape_cast %106 : vector<1x1x2x96xf32> to vector<2x96xf32>
    %cst_37 = arith.constant dense<0.000000e+00> : vector<2x96xf32>
    %108 = tpu.matmul %93, %2, %cst_37 {dimension_numbers = #tpu.dot_dimension_numbers<[1], [0], [0], [1], [0, 0, 1, 1], [], []>} : vector<2x32xf32>, vector<32x96xf32>, vector<2x96xf32> -> vector<2x96xf32>
    %109 = vector.extract_strided_slice %107 {offsets = [0, 0], sizes = [2, 32], strides = [1, 1]} : vector<2x96xf32> to vector<2x32xf32>
    %110 = vector.extract_strided_slice %108 {offsets = [0, 0], sizes = [2, 32], strides = [1, 1]} : vector<2x96xf32> to vector<2x32xf32>
    %111 = arith.addf %109, %110 : vector<2x32xf32>
    %112 = arith.negf %111 : vector<2x32xf32>
    %113 = math.exp %112 : vector<2x32xf32>
    %cst_38 = arith.constant 1.000000e+00 : f32
    %114 = vector.broadcast %cst_38 : f32 to vector<2x32xf32>
    %115 = arith.addf %114, %113 : vector<2x32xf32>
    %116 = arith.divf %114, %115 : vector<2x32xf32>
    %117 = vector.extract_strided_slice %107 {offsets = [0, 32], sizes = [2, 32], strides = [1, 1]} : vector<2x96xf32> to vector<2x32xf32>
    %118 = vector.extract_strided_slice %108 {offsets = [0, 32], sizes = [2, 32], strides = [1, 1]} : vector<2x96xf32> to vector<2x32xf32>
    %119 = arith.addf %117, %118 : vector<2x32xf32>
    %120 = arith.negf %119 : vector<2x32xf32>
    %121 = math.exp %120 : vector<2x32xf32>
    %cst_39 = arith.constant 1.000000e+00 : f32
    %122 = vector.broadcast %cst_39 : f32 to vector<2x32xf32>
    %123 = arith.addf %122, %121 : vector<2x32xf32>
    %124 = arith.divf %122, %123 : vector<2x32xf32>
    %125 = vector.extract_strided_slice %107 {offsets = [0, 64], sizes = [2, 32], strides = [1, 1]} : vector<2x96xf32> to vector<2x32xf32>
    %126 = vector.extract_strided_slice %108 {offsets = [0, 64], sizes = [2, 32], strides = [1, 1]} : vector<2x96xf32> to vector<2x32xf32>
    %127 = vector.broadcast %4 : vector<1x32xf32> to vector<2x32xf32>
    %128 = arith.addf %126, %127 : vector<2x32xf32>
    %129 = arith.mulf %116, %128 : vector<2x32xf32>
    %130 = arith.addf %125, %129 : vector<2x32xf32>
    %131 = math.tanh %130 : vector<2x32xf32>
    %cst_40 = arith.constant 1.000000e+00 : f32
    %132 = vector.broadcast %cst_40 : f32 to vector<2x32xf32>
    %133 = arith.subf %132, %124 : vector<2x32xf32>
    %134 = arith.mulf %133, %131 : vector<2x32xf32>
    %135 = arith.mulf %124, %93 : vector<2x32xf32>
    %136 = arith.addf %134, %135 : vector<2x32xf32>
    %137 = vector.broadcast %104 : i32 to vector<2x1xi32>
    %138 = arith.cmpi sgt, %0, %137 : vector<2x1xi32>
    %139 = vector.shape_cast %138 : vector<2x1xi1> to vector<2x1xi1>
    %140 = vector.broadcast %139 : vector<2x1xi1> to vector<2x32xi1>
    %141 = arith.select %140, %136, %93 : vector<2x32xi1>, vector<2x32xf32>
    %cst_41 = arith.constant 0.000000e+00 : f32
    %142 = vector.shape_cast %138 : vector<2x1xi1> to vector<2x1xi1>
    %143 = vector.broadcast %142 : vector<2x1xi1> to vector<2x32xi1>
    %144 = vector.broadcast %cst_41 : f32 to vector<2x32xf32>
    %145 = arith.select %143, %141, %144 : vector<2x32xi1>, vector<2x32xf32>
    %c0_42 = arith.constant 0 : index
    %146 = arith.index_cast %104 : i32 to index
    %c0_43 = arith.constant 0 : index
    %c0_44 = arith.constant 0 : index
    %147 = vector.load %arg5[%c0_42, %146, %c0_43, %c0_44] : memref<1x8x2x32xf32, #tpu.memory_space<vmem>>, vector<1x1x2x32xf32>
    %148 = vector.shape_cast %147 : vector<1x1x2x32xf32> to vector<2x32xf32>
    %149 = vector.shape_cast %145 : vector<2x32xf32> to vector<1x1x2x32xf32>
    tpu.vector_store %arg5[%c0_42, %146, %c0_43, %c0_44], %149 {strides = array<i32>} : memref<1x8x2x32xf32, #tpu.memory_space<vmem>>, vector<1x1x2x32xf32>,
    %c3_i32 = arith.constant 3 : i32
    %c0_i32_45 = arith.constant 0 : i32
    %150 = arith.cmpi eq, %arg0, %c0_i32_45 : i32
    %c7_i32_46 = arith.constant 7 : i32
    %151 = arith.subi %c7_i32_46, %c3_i32 : i32
    %152 = arith.select %150, %c3_i32, %151 : i32
    %c0_47 = arith.constant 0 : index
    %153 = arith.index_cast %152 : i32 to index
    %c0_48 = arith.constant 0 : index
    %c0_49 = arith.constant 0 : index
    %154 = vector.load %arg2[%c0_47, %153, %c0_48, %c0_49] : memref<1x8x2x96xf32, #tpu.memory_space<vmem>>, vector<1x1x2x96xf32>
    %155 = vector.shape_cast %154 : vector<1x1x2x96xf32> to vector<2x96xf32>
    %cst_50 = arith.constant dense<0.000000e+00> : vector<2x96xf32>
    %156 = tpu.matmul %141, %2, %cst_50 {dimension_numbers = #tpu.dot_dimension_numbers<[1], [0], [0], [1], [0, 0, 1, 1], [], []>} : vector<2x32xf32>, vector<32x96xf32>, vector<2x96xf32> -> vector<2x96xf32>
    %157 = vector.extract_strided_slice %155 {offsets = [0, 0], sizes = [2, 32], strides = [1, 1]} : vector<2x96xf32> to vector<2x32xf32>
    %158 = vector.extract_strided_slice %156 {offsets = [0, 0], sizes = [2, 32], strides = [1, 1]} : vector<2x96xf32> to vector<2x32xf32>
    %159 = arith.addf %157, %158 : vector<2x32xf32>
    %160 = arith.negf %159 : vector<2x32xf32>
    %161 = math.exp %160 : vector<2x32xf32>
    %cst_51 = arith.constant 1.000000e+00 : f32
    %162 = vector.broadcast %cst_51 : f32 to vector<2x32xf32>
    %163 = arith.addf %162, %161 : vector<2x32xf32>
    %164 = arith.divf %162, %163 : vector<2x32xf32>
    %165 = vector.extract_strided_slice %155 {offsets = [0, 32], sizes = [2, 32], strides = [1, 1]} : vector<2x96xf32> to vector<2x32xf32>
    %166 = vector.extract_strided_slice %156 {offsets = [0, 32], sizes = [2, 32], strides = [1, 1]} : vector<2x96xf32> to vector<2x32xf32>
    %167 = arith.addf %165, %166 : vector<2x32xf32>
    %168 = arith.negf %167 : vector<2x32xf32>
    %169 = math.exp %168 : vector<2x32xf32>
    %cst_52 = arith.constant 1.000000e+00 : f32
    %170 = vector.broadcast %cst_52 : f32 to vector<2x32xf32>
    %171 = arith.addf %170, %169 : vector<2x32xf32>
    %172 = arith.divf %170, %171 : vector<2x32xf32>
    %173 = vector.extract_strided_slice %155 {offsets = [0, 64], sizes = [2, 32], strides = [1, 1]} : vector<2x96xf32> to vector<2x32xf32>
    %174 = vector.extract_strided_slice %156 {offsets = [0, 64], sizes = [2, 32], strides = [1, 1]} : vector<2x96xf32> to vector<2x32xf32>
    %175 = vector.broadcast %4 : vector<1x32xf32> to vector<2x32xf32>
    %176 = arith.addf %174, %175 : vector<2x32xf32>
    %177 = arith.mulf %164, %176 : vector<2x32xf32>
    %178 = arith.addf %173, %177 : vector<2x32xf32>
    %179 = math.tanh %178 : vector<2x32xf32>
    %cst_53 = arith.constant 1.000000e+00 : f32
    %180 = vector.broadcast %cst_53 : f32 to vector<2x32xf32>
    %181 = arith.subf %180, %172 : vector<2x32xf32>
    %182 = arith.mulf %181, %179 : vector<2x32xf32>
    %183 = arith.mulf %172, %141 : vector<2x32xf32>
    %184 = arith.addf %182, %183 : vector<2x32xf32>
    %185 = vector.broadcast %152 : i32 to vector<2x1xi32>
    %186 = arith.cmpi sgt, %0, %185 : vector<2x1xi32>
    %187 = vector.shape_cast %186 : vector<2x1xi1> to vector<2x1xi1>
    %188 = vector.broadcast %187 : vector<2x1xi1> to vector<2x32xi1>
    %189 = arith.select %188, %184, %141 : vector<2x32xi1>, vector<2x32xf32>
    %cst_54 = arith.constant 0.000000e+00 : f32
    %190 = vector.shape_cast %186 : vector<2x1xi1> to vector<2x1xi1>
    %191 = vector.broadcast %190 : vector<2x1xi1> to vector<2x32xi1>
    %192 = vector.broadcast %cst_54 : f32 to vector<2x32xf32>
    %193 = arith.select %191, %189, %192 : vector<2x32xi1>, vector<2x32xf32>
    %c0_55 = arith.constant 0 : index
    %194 = arith.index_cast %152 : i32 to index
    %c0_56 = arith.constant 0 : index
    %c0_57 = arith.constant 0 : index
    %195 = vector.load %arg5[%c0_55, %194, %c0_56, %c0_57] : memref<1x8x2x32xf32, #tpu.memory_space<vmem>>, vector<1x1x2x32xf32>
    %196 = vector.shape_cast %195 : vector<1x1x2x32xf32> to vector<2x32xf32>
    %197 = vector.shape_cast %193 : vector<2x32xf32> to vector<1x1x2x32xf32>
    tpu.vector_store %arg5[%c0_55, %194, %c0_56, %c0_57], %197 {strides = array<i32>} : memref<1x8x2x32xf32, #tpu.memory_space<vmem>>, vector<1x1x2x32xf32>,
    %c4_i32 = arith.constant 4 : i32
    %c0_i32_58 = arith.constant 0 : i32
    %198 = arith.cmpi eq, %arg0, %c0_i32_58 : i32
    %c7_i32_59 = arith.constant 7 : i32
    %199 = arith.subi %c7_i32_59, %c4_i32 : i32
    %200 = arith.select %198, %c4_i32, %199 : i32
    %c0_60 = arith.constant 0 : index
    %201 = arith.index_cast %200 : i32 to index
    %c0_61 = arith.constant 0 : index
    %c0_62 = arith.constant 0 : index
    %202 = vector.load %arg2[%c0_60, %201, %c0_61, %c0_62] : memref<1x8x2x96xf32, #tpu.memory_space<vmem>>, vector<1x1x2x96xf32>
    %203 = vector.shape_cast %202 : vector<1x1x2x96xf32> to vector<2x96xf32>
    %cst_63 = arith.constant dense<0.000000e+00> : vector<2x96xf32>
    %204 = tpu.matmul %189, %2, %cst_63 {dimension_numbers = #tpu.dot_dimension_numbers<[1], [0], [0], [1], [0, 0, 1, 1], [], []>} : vector<2x32xf32>, vector<32x96xf32>, vector<2x96xf32> -> vector<2x96xf32>
    %205 = vector.extract_strided_slice %203 {offsets = [0, 0], sizes = [2, 32], strides = [1, 1]} : vector<2x96xf32> to vector<2x32xf32>
    %206 = vector.extract_strided_slice %204 {offsets = [0, 0], sizes = [2, 32], strides = [1, 1]} : vector<2x96xf32> to vector<2x32xf32>
    %207 = arith.addf %205, %206 : vector<2x32xf32>
    %208 = arith.negf %207 : vector<2x32xf32>
    %209 = math.exp %208 : vector<2x32xf32>
    %cst_64 = arith.constant 1.000000e+00 : f32
    %210 = vector.broadcast %cst_64 : f32 to vector<2x32xf32>
    %211 = arith.addf %210, %209 : vector<2x32xf32>
    %212 = arith.divf %210, %211 : vector<2x32xf32>
    %213 = vector.extract_strided_slice %203 {offsets = [0, 32], sizes = [2, 32], strides = [1, 1]} : vector<2x96xf32> to vector<2x32xf32>
    %214 = vector.extract_strided_slice %204 {offsets = [0, 32], sizes = [2, 32], strides = [1, 1]} : vector<2x96xf32> to vector<2x32xf32>
    %215 = arith.addf %213, %214 : vector<2x32xf32>
    %216 = arith.negf %215 : vector<2x32xf32>
    %217 = math.exp %216 : vector<2x32xf32>
    %cst_65 = arith.constant 1.000000e+00 : f32
    %218 = vector.broadcast %cst_65 : f32 to vector<2x32xf32>
    %219 = arith.addf %218, %217 : vector<2x32xf32>
    %220 = arith.divf %218, %219 : vector<2x32xf32>
    %221 = vector.extract_strided_slice %203 {offsets = [0, 64], sizes = [2, 32], strides = [1, 1]} : vector<2x96xf32> to vector<2x32xf32>
    %222 = vector.extract_strided_slice %204 {offsets = [0, 64], sizes = [2, 32], strides = [1, 1]} : vector<2x96xf32> to vector<2x32xf32>
    %223 = vector.broadcast %4 : vector<1x32xf32> to vector<2x32xf32>
    %224 = arith.addf %222, %223 : vector<2x32xf32>
    %225 = arith.mulf %212, %224 : vector<2x32xf32>
    %226 = arith.addf %221, %225 : vector<2x32xf32>
    %227 = math.tanh %226 : vector<2x32xf32>
    %cst_66 = arith.constant 1.000000e+00 : f32
    %228 = vector.broadcast %cst_66 : f32 to vector<2x32xf32>
    %229 = arith.subf %228, %220 : vector<2x32xf32>
    %230 = arith.mulf %229, %227 : vector<2x32xf32>
    %231 = arith.mulf %220, %189 : vector<2x32xf32>
    %232 = arith.addf %230, %231 : vector<2x32xf32>
    %233 = vector.broadcast %200 : i32 to vector<2x1xi32>
    %234 = arith.cmpi sgt, %0, %233 : vector<2x1xi32>
    %235 = vector.shape_cast %234 : vector<2x1xi1> to vector<2x1xi1>
    %236 = vector.broadcast %235 : vector<2x1xi1> to vector<2x32xi1>
    %237 = arith.select %236, %232, %189 : vector<2x32xi1>, vector<2x32xf32>
    %cst_67 = arith.constant 0.000000e+00 : f32
    %238 = vector.shape_cast %234 : vector<2x1xi1> to vector<2x1xi1>
    %239 = vector.broadcast %238 : vector<2x1xi1> to vector<2x32xi1>
    %240 = vector.broadcast %cst_67 : f32 to vector<2x32xf32>
    %241 = arith.select %239, %237, %240 : vector<2x32xi1>, vector<2x32xf32>
    %c0_68 = arith.constant 0 : index
    %242 = arith.index_cast %200 : i32 to index
    %c0_69 = arith.constant 0 : index
    %c0_70 = arith.constant 0 : index
    %243 = vector.load %arg5[%c0_68, %242, %c0_69, %c0_70] : memref<1x8x2x32xf32, #tpu.memory_space<vmem>>, vector<1x1x2x32xf32>
    %244 = vector.shape_cast %243 : vector<1x1x2x32xf32> to vector<2x32xf32>
    %245 = vector.shape_cast %241 : vector<2x32xf32> to vector<1x1x2x32xf32>
    tpu.vector_store %arg5[%c0_68, %242, %c0_69, %c0_70], %245 {strides = array<i32>} : memref<1x8x2x32xf32, #tpu.memory_space<vmem>>, vector<1x1x2x32xf32>,
    %c5_i32 = arith.constant 5 : i32
    %c0_i32_71 = arith.constant 0 : i32
    %246 = arith.cmpi eq, %arg0, %c0_i32_71 : i32
    %c7_i32_72 = arith.constant 7 : i32
    %247 = arith.subi %c7_i32_72, %c5_i32 : i32
    %248 = arith.select %246, %c5_i32, %247 : i32
    %c0_73 = arith.constant 0 : index
    %249 = arith.index_cast %248 : i32 to index
    %c0_74 = arith.constant 0 : index
    %c0_75 = arith.constant 0 : index
    %250 = vector.load %arg2[%c0_73, %249, %c0_74, %c0_75] : memref<1x8x2x96xf32, #tpu.memory_space<vmem>>, vector<1x1x2x96xf32>
    %251 = vector.shape_cast %250 : vector<1x1x2x96xf32> to vector<2x96xf32>
    %cst_76 = arith.constant dense<0.000000e+00> : vector<2x96xf32>
    %252 = tpu.matmul %237, %2, %cst_76 {dimension_numbers = #tpu.dot_dimension_numbers<[1], [0], [0], [1], [0, 0, 1, 1], [], []>} : vector<2x32xf32>, vector<32x96xf32>, vector<2x96xf32> -> vector<2x96xf32>
    %253 = vector.extract_strided_slice %251 {offsets = [0, 0], sizes = [2, 32], strides = [1, 1]} : vector<2x96xf32> to vector<2x32xf32>
    %254 = vector.extract_strided_slice %252 {offsets = [0, 0], sizes = [2, 32], strides = [1, 1]} : vector<2x96xf32> to vector<2x32xf32>
    %255 = arith.addf %253, %254 : vector<2x32xf32>
    %256 = arith.negf %255 : vector<2x32xf32>
    %257 = math.exp %256 : vector<2x32xf32>
    %cst_77 = arith.constant 1.000000e+00 : f32
    %258 = vector.broadcast %cst_77 : f32 to vector<2x32xf32>
    %259 = arith.addf %258, %257 : vector<2x32xf32>
    %260 = arith.divf %258, %259 : vector<2x32xf32>
    %261 = vector.extract_strided_slice %251 {offsets = [0, 32], sizes = [2, 32], strides = [1, 1]} : vector<2x96xf32> to vector<2x32xf32>
    %262 = vector.extract_strided_slice %252 {offsets = [0, 32], sizes = [2, 32], strides = [1, 1]} : vector<2x96xf32> to vector<2x32xf32>
    %263 = arith.addf %261, %262 : vector<2x32xf32>
    %264 = arith.negf %263 : vector<2x32xf32>
    %265 = math.exp %264 : vector<2x32xf32>
    %cst_78 = arith.constant 1.000000e+00 : f32
    %266 = vector.broadcast %cst_78 : f32 to vector<2x32xf32>
    %267 = arith.addf %266, %265 : vector<2x32xf32>
    %268 = arith.divf %266, %267 : vector<2x32xf32>
    %269 = vector.extract_strided_slice %251 {offsets = [0, 64], sizes = [2, 32], strides = [1, 1]} : vector<2x96xf32> to vector<2x32xf32>
    %270 = vector.extract_strided_slice %252 {offsets = [0, 64], sizes = [2, 32], strides = [1, 1]} : vector<2x96xf32> to vector<2x32xf32>
    %271 = vector.broadcast %4 : vector<1x32xf32> to vector<2x32xf32>
    %272 = arith.addf %270, %271 : vector<2x32xf32>
    %273 = arith.mulf %260, %272 : vector<2x32xf32>
    %274 = arith.addf %269, %273 : vector<2x32xf32>
    %275 = math.tanh %274 : vector<2x32xf32>
    %cst_79 = arith.constant 1.000000e+00 : f32
    %276 = vector.broadcast %cst_79 : f32 to vector<2x32xf32>
    %277 = arith.subf %276, %268 : vector<2x32xf32>
    %278 = arith.mulf %277, %275 : vector<2x32xf32>
    %279 = arith.mulf %268, %237 : vector<2x32xf32>
    %280 = arith.addf %278, %279 : vector<2x32xf32>
    %281 = vector.broadcast %248 : i32 to vector<2x1xi32>
    %282 = arith.cmpi sgt, %0, %281 : vector<2x1xi32>
    %283 = vector.shape_cast %282 : vector<2x1xi1> to vector<2x1xi1>
    %284 = vector.broadcast %283 : vector<2x1xi1> to vector<2x32xi1>
    %285 = arith.select %284, %280, %237 : vector<2x32xi1>, vector<2x32xf32>
    %cst_80 = arith.constant 0.000000e+00 : f32
    %286 = vector.shape_cast %282 : vector<2x1xi1> to vector<2x1xi1>
    %287 = vector.broadcast %286 : vector<2x1xi1> to vector<2x32xi1>
    %288 = vector.broadcast %cst_80 : f32 to vector<2x32xf32>
    %289 = arith.select %287, %285, %288 : vector<2x32xi1>, vector<2x32xf32>
    %c0_81 = arith.constant 0 : index
    %290 = arith.index_cast %248 : i32 to index
    %c0_82 = arith.constant 0 : index
    %c0_83 = arith.constant 0 : index
    %291 = vector.load %arg5[%c0_81, %290, %c0_82, %c0_83] : memref<1x8x2x32xf32, #tpu.memory_space<vmem>>, vector<1x1x2x32xf32>
    %292 = vector.shape_cast %291 : vector<1x1x2x32xf32> to vector<2x32xf32>
    %293 = vector.shape_cast %289 : vector<2x32xf32> to vector<1x1x2x32xf32>
    tpu.vector_store %arg5[%c0_81, %290, %c0_82, %c0_83], %293 {strides = array<i32>} : memref<1x8x2x32xf32, #tpu.memory_space<vmem>>, vector<1x1x2x32xf32>,
    %c6_i32 = arith.constant 6 : i32
    %c0_i32_84 = arith.constant 0 : i32
    %294 = arith.cmpi eq, %arg0, %c0_i32_84 : i32
    %c7_i32_85 = arith.constant 7 : i32
    %295 = arith.subi %c7_i32_85, %c6_i32 : i32
    %296 = arith.select %294, %c6_i32, %295 : i32
    %c0_86 = arith.constant 0 : index
    %297 = arith.index_cast %296 : i32 to index
    %c0_87 = arith.constant 0 : index
    %c0_88 = arith.constant 0 : index
    %298 = vector.load %arg2[%c0_86, %297, %c0_87, %c0_88] : memref<1x8x2x96xf32, #tpu.memory_space<vmem>>, vector<1x1x2x96xf32>
    %299 = vector.shape_cast %298 : vector<1x1x2x96xf32> to vector<2x96xf32>
    %cst_89 = arith.constant dense<0.000000e+00> : vector<2x96xf32>
    %300 = tpu.matmul %285, %2, %cst_89 {dimension_numbers = #tpu.dot_dimension_numbers<[1], [0], [0], [1], [0, 0, 1, 1], [], []>} : vector<2x32xf32>, vector<32x96xf32>, vector<2x96xf32> -> vector<2x96xf32>
    %301 = vector.extract_strided_slice %299 {offsets = [0, 0], sizes = [2, 32], strides = [1, 1]} : vector<2x96xf32> to vector<2x32xf32>
    %302 = vector.extract_strided_slice %300 {offsets = [0, 0], sizes = [2, 32], strides = [1, 1]} : vector<2x96xf32> to vector<2x32xf32>
    %303 = arith.addf %301, %302 : vector<2x32xf32>
    %304 = arith.negf %303 : vector<2x32xf32>
    %305 = math.exp %304 : vector<2x32xf32>
    %cst_90 = arith.constant 1.000000e+00 : f32
    %306 = vector.broadcast %cst_90 : f32 to vector<2x32xf32>
    %307 = arith.addf %306, %305 : vector<2x32xf32>
    %308 = arith.divf %306, %307 : vector<2x32xf32>
    %309 = vector.extract_strided_slice %299 {offsets = [0, 32], sizes = [2, 32], strides = [1, 1]} : vector<2x96xf32> to vector<2x32xf32>
    %310 = vector.extract_strided_slice %300 {offsets = [0, 32], sizes = [2, 32], strides = [1, 1]} : vector<2x96xf32> to vector<2x32xf32>
    %311 = arith.addf %309, %310 : vector<2x32xf32>
    %312 = arith.negf %311 : vector<2x32xf32>
    %313 = math.exp %312 : vector<2x32xf32>
    %cst_91 = arith.constant 1.000000e+00 : f32
    %314 = vector.broadcast %cst_91 : f32 to vector<2x32xf32>
    %315 = arith.addf %314, %313 : vector<2x32xf32>
    %316 = arith.divf %314, %315 : vector<2x32xf32>
    %317 = vector.extract_strided_slice %299 {offsets = [0, 64], sizes = [2, 32], strides = [1, 1]} : vector<2x96xf32> to vector<2x32xf32>
    %318 = vector.extract_strided_slice %300 {offsets = [0, 64], sizes = [2, 32], strides = [1, 1]} : vector<2x96xf32> to vector<2x32xf32>
    %319 = vector.broadcast %4 : vector<1x32xf32> to vector<2x32xf32>
    %320 = arith.addf %318, %319 : vector<2x32xf32>
    %321 = arith.mulf %308, %320 : vector<2x32xf32>
    %322 = arith.addf %317, %321 : vector<2x32xf32>
    %323 = math.tanh %322 : vector<2x32xf32>
    %cst_92 = arith.constant 1.000000e+00 : f32
    %324 = vector.broadcast %cst_92 : f32 to vector<2x32xf32>
    %325 = arith.subf %324, %316 : vector<2x32xf32>
    %326 = arith.mulf %325, %323 : vector<2x32xf32>
    %327 = arith.mulf %316, %285 : vector<2x32xf32>
    %328 = arith.addf %326, %327 : vector<2x32xf32>
    %329 = vector.broadcast %296 : i32 to vector<2x1xi32>
    %330 = arith.cmpi sgt, %0, %329 : vector<2x1xi32>
    %331 = vector.shape_cast %330 : vector<2x1xi1> to vector<2x1xi1>
    %332 = vector.broadcast %331 : vector<2x1xi1> to vector<2x32xi1>
    %333 = arith.select %332, %328, %285 : vector<2x32xi1>, vector<2x32xf32>
    %cst_93 = arith.constant 0.000000e+00 : f32
    %334 = vector.shape_cast %330 : vector<2x1xi1> to vector<2x1xi1>
    %335 = vector.broadcast %334 : vector<2x1xi1> to vector<2x32xi1>
    %336 = vector.broadcast %cst_93 : f32 to vector<2x32xf32>
    %337 = arith.select %335, %333, %336 : vector<2x32xi1>, vector<2x32xf32>
    %c0_94 = arith.constant 0 : index
    %338 = arith.index_cast %296 : i32 to index
    %c0_95 = arith.constant 0 : index
    %c0_96 = arith.constant 0 : index
    %339 = vector.load %arg5[%c0_94, %338, %c0_95, %c0_96] : memref<1x8x2x32xf32, #tpu.memory_space<vmem>>, vector<1x1x2x32xf32>
    %340 = vector.shape_cast %339 : vector<1x1x2x32xf32> to vector<2x32xf32>
    %341 = vector.shape_cast %337 : vector<2x32xf32> to vector<1x1x2x32xf32>
    tpu.vector_store %arg5[%c0_94, %338, %c0_95, %c0_96], %341 {strides = array<i32>} : memref<1x8x2x32xf32, #tpu.memory_space<vmem>>, vector<1x1x2x32xf32>,
    %c7_i32_97 = arith.constant 7 : i32
    %c0_i32_98 = arith.constant 0 : i32
    %342 = arith.cmpi eq, %arg0, %c0_i32_98 : i32
    %c7_i32_99 = arith.constant 7 : i32
    %343 = arith.subi %c7_i32_99, %c7_i32_97 : i32
    %344 = arith.select %342, %c7_i32_97, %343 : i32
    %c0_100 = arith.constant 0 : index
    %345 = arith.index_cast %344 : i32 to index
    %c0_101 = arith.constant 0 : index
    %c0_102 = arith.constant 0 : index
    %346 = vector.load %arg2[%c0_100, %345, %c0_101, %c0_102] : memref<1x8x2x96xf32, #tpu.memory_space<vmem>>, vector<1x1x2x96xf32>
    %347 = vector.shape_cast %346 : vector<1x1x2x96xf32> to vector<2x96xf32>
    %cst_103 = arith.constant dense<0.000000e+00> : vector<2x96xf32>
    %348 = tpu.matmul %333, %2, %cst_103 {dimension_numbers = #tpu.dot_dimension_numbers<[1], [0], [0], [1], [0, 0, 1, 1], [], []>} : vector<2x32xf32>, vector<32x96xf32>, vector<2x96xf32> -> vector<2x96xf32>
    %349 = vector.extract_strided_slice %347 {offsets = [0, 0], sizes = [2, 32], strides = [1, 1]} : vector<2x96xf32> to vector<2x32xf32>
    %350 = vector.extract_strided_slice %348 {offsets = [0, 0], sizes = [2, 32], strides = [1, 1]} : vector<2x96xf32> to vector<2x32xf32>
    %351 = arith.addf %349, %350 : vector<2x32xf32>
    %352 = arith.negf %351 : vector<2x32xf32>
    %353 = math.exp %352 : vector<2x32xf32>
    %cst_104 = arith.constant 1.000000e+00 : f32
    %354 = vector.broadcast %cst_104 : f32 to vector<2x32xf32>
    %355 = arith.addf %354, %353 : vector<2x32xf32>
    %356 = arith.divf %354, %355 : vector<2x32xf32>
    %357 = vector.extract_strided_slice %347 {offsets = [0, 32], sizes = [2, 32], strides = [1, 1]} : vector<2x96xf32> to vector<2x32xf32>
    %358 = vector.extract_strided_slice %348 {offsets = [0, 32], sizes = [2, 32], strides = [1, 1]} : vector<2x96xf32> to vector<2x32xf32>
    %359 = arith.addf %357, %358 : vector<2x32xf32>
    %360 = arith.negf %359 : vector<2x32xf32>
    %361 = math.exp %360 : vector<2x32xf32>
    %cst_105 = arith.constant 1.000000e+00 : f32
    %362 = vector.broadcast %cst_105 : f32 to vector<2x32xf32>
    %363 = arith.addf %362, %361 : vector<2x32xf32>
    %364 = arith.divf %362, %363 : vector<2x32xf32>
    %365 = vector.extract_strided_slice %347 {offsets = [0, 64], sizes = [2, 32], strides = [1, 1]} : vector<2x96xf32> to vector<2x32xf32>
    %366 = vector.extract_strided_slice %348 {offsets = [0, 64], sizes = [2, 32], strides = [1, 1]} : vector<2x96xf32> to vector<2x32xf32>
    %367 = vector.broadcast %4 : vector<1x32xf32> to vector<2x32xf32>
    %368 = arith.addf %366, %367 : vector<2x32xf32>
    %369 = arith.mulf %356, %368 : vector<2x32xf32>
    %370 = arith.addf %365, %369 : vector<2x32xf32>
    %371 = math.tanh %370 : vector<2x32xf32>
    %cst_106 = arith.constant 1.000000e+00 : f32
    %372 = vector.broadcast %cst_106 : f32 to vector<2x32xf32>
    %373 = arith.subf %372, %364 : vector<2x32xf32>
    %374 = arith.mulf %373, %371 : vector<2x32xf32>
    %375 = arith.mulf %364, %333 : vector<2x32xf32>
    %376 = arith.addf %374, %375 : vector<2x32xf32>
    %377 = vector.broadcast %344 : i32 to vector<2x1xi32>
    %378 = arith.cmpi sgt, %0, %377 : vector<2x1xi32>
    %379 = vector.shape_cast %378 : vector<2x1xi1> to vector<2x1xi1>
    %380 = vector.broadcast %379 : vector<2x1xi1> to vector<2x32xi1>
    %381 = arith.select %380, %376, %333 : vector<2x32xi1>, vector<2x32xf32>
    %cst_107 = arith.constant 0.000000e+00 : f32
    %382 = vector.shape_cast %378 : vector<2x1xi1> to vector<2x1xi1>
    %383 = vector.broadcast %382 : vector<2x1xi1> to vector<2x32xi1>
    %384 = vector.broadcast %cst_107 : f32 to vector<2x32xf32>
    %385 = arith.select %383, %381, %384 : vector<2x32xi1>, vector<2x32xf32>
    %c0_108 = arith.constant 0 : index
    %386 = arith.index_cast %344 : i32 to index
    %c0_109 = arith.constant 0 : index
    %c0_110 = arith.constant 0 : index
    %387 = vector.load %arg5[%c0_108, %386, %c0_109, %c0_110] : memref<1x8x2x32xf32, #tpu.memory_space<vmem>>, vector<1x1x2x32xf32>
    %388 = vector.shape_cast %387 : vector<1x1x2x32xf32> to vector<2x32xf32>
    %389 = vector.shape_cast %385 : vector<2x32xf32> to vector<1x1x2x32xf32>
    tpu.vector_store %arg5[%c0_108, %386, %c0_109, %c0_110], %389 {strides = array<i32>} : memref<1x8x2x32xf32, #tpu.memory_space<vmem>>, vector<1x1x2x32xf32>,
    %c8_i32 = arith.constant 8 : i32
    %c0_111 = arith.constant 0 : index
    %c0_112 = arith.constant 0 : index
    %c0_113 = arith.constant 0 : index
    %390 = vector.load %arg6[%c0_111, %c0_112, %c0_113] : memref<1x2x32xf32, #tpu.memory_space<vmem>>, vector<1x2x32xf32>
    %391 = vector.shape_cast %390 : vector<1x2x32xf32> to vector<2x32xf32>
    %392 = vector.shape_cast %381 : vector<2x32xf32> to vector<1x2x32xf32>
    tpu.vector_store %arg6[%c0_111, %c0_112, %c0_113], %392 {strides = array<i32>} : memref<1x2x32xf32, #tpu.memory_space<vmem>>, vector<1x2x32xf32>,
    return
  }
  func.func @transform_0(%arg0: i32) -> (i32, i32) {
    %c0_i32 = arith.constant 0 : i32
    %c0_i32_0 = arith.constant 0 : i32
    %c0_i32_1 = arith.constant 0 : i32
    return %c0_i32, %c0_i32_0 : i32, i32
  }
  func.func @transform_1(%arg0: i32) -> (i32, i32, i32, i32) {
    %c0_i32 = arith.constant 0 : i32
    %c0_i32_0 = arith.constant 0 : i32
    %c0_i32_1 = arith.constant 0 : i32
    %c0_i32_2 = arith.constant 0 : i32
    return %arg0, %c0_i32, %c0_i32_0, %c0_i32_1 : i32, i32, i32, i32
  }
  func.func @transform_2(%arg0: i32) -> (i32, i32, i32) {
    %c0_i32 = arith.constant 0 : i32
    %c0_i32_0 = arith.constant 0 : i32
    %c0_i32_1 = arith.constant 0 : i32
    return %arg0, %c0_i32, %c0_i32_0 : i32, i32, i32
  }
  func.func @transform_3(%arg0: i32) -> (i32, i32, i32) {
    %c0_i32 = arith.constant 0 : i32
    %c0_i32_0 = arith.constant 0 : i32
    %c0_i32_1 = arith.constant 0 : i32
    return %arg0, %c0_i32, %c0_i32_0 : i32, i32, i32
  }
  func.func @transform_4(%arg0: i32) -> (i32, i32, i32, i32) {
    %c0_i32 = arith.constant 0 : i32
    %c0_i32_0 = arith.constant 0 : i32
    %c0_i32_1 = arith.constant 0 : i32
    %c0_i32_2 = arith.constant 0 : i32
    return %arg0, %c0_i32, %c0_i32_0, %c0_i32_1 : i32, i32, i32, i32
  }
  func.func @transform_5(%arg0: i32) -> (i32, i32, i32) {
    %c0_i32 = arith.constant 0 : i32
    %c0_i32_0 = arith.constant 0 : i32
    %c0_i32_1 = arith.constant 0 : i32
    return %arg0, %c0_i32, %c0_i32_0 : i32, i32, i32
  }
}

module attributes {stable_mosaic.version = 11 : i64} {
  func.func @kernel(%arg0: i32, %arg1: memref<2x1xi32, #tpu.memory_space<vmem>>, %arg2: memref<1x8x2x96xf32, #tpu.memory_space<vmem>>, %arg3: memref<1x32x96xf32, #tpu.memory_space<vmem>>, %arg4: memref<1x1x32xf32, #tpu.memory_space<vmem>>, %arg5: memref<1x8x2x32xf32, #tpu.memory_space<vmem>>, %arg6: memref<1x2x32xf32, #tpu.memory_space<vmem>>) attributes {dimension_semantics = [#tpu.dimension_semantics<parallel>], iteration_bounds = array<i64: 2>, scalar_prefetch = 0 : i64, scratch_operands = 0 : i64, tpu.core_type = #tpu.core_type<tc>, window_params = [{pipeline_mode = #tpu.pipeline_mode<synchronous>, transform_indices = @transform_0, window_bounds = array<i64: 2, 1>}, {transform_indices = @transform_1, window_bounds = array<i64: 1, 8, 2, 96>}, {transform_indices = @transform_2, window_bounds = array<i64: 1, 32, 96>}, {transform_indices = @transform_3, window_bounds = array<i64: 1, 1, 32>}, {transform_indices = @transform_4, window_bounds = array<i64: 1, 8, 2, 32>}, {transform_indices = @transform_5, window_bounds = array<i64: 1, 2, 32>}]} {
    %c0 = arith.constant 0 : index
    %c0_0 = arith.constant 0 : index
    %0 = vector.load %arg1[%c0, %c0_0] : memref<2x1xi32, #tpu.memory_space<vmem>>, vector<2x1xi32>
    %c0_1 = arith.constant 0 : index
    %c0_2 = arith.constant 0 : index
    %c0_3 = arith.constant 0 : index
    %1 = vector.load %arg3[%c0_1, %c0_2, %c0_3] : memref<1x32x96xf32, #tpu.memory_space<vmem>>, vector<1x32x96xf32>
    %2 = vector.shape_cast %1 : vector<1x32x96xf32> to vector<32x96xf32>
    %c0_4 = arith.constant 0 : index
    %c0_5 = arith.constant 0 : index
    %c0_6 = arith.constant 0 : index
    %3 = vector.load %arg4[%c0_4, %c0_5, %c0_6] : memref<1x1x32xf32, #tpu.memory_space<vmem>>, vector<1x1x32xf32>
    %4 = vector.shape_cast %3 : vector<1x1x32xf32> to vector<1x32xf32>
    %cst = arith.constant 0.000000e+00 : f32
    %5 = vector.broadcast %cst : f32 to vector<2x32xf32>
    %c0_i32 = arith.constant 0 : i32
    %c0_i32_7 = arith.constant 0 : i32
    %6 = arith.cmpi eq, %arg0, %c0_i32_7 : i32
    %c7_i32 = arith.constant 7 : i32
    %7 = arith.subi %c7_i32, %c0_i32 : i32
    %8 = arith.select %6, %c0_i32, %7 : i32
    %c0_8 = arith.constant 0 : index
    %9 = arith.index_cast %8 : i32 to index
    %c0_9 = arith.constant 0 : index
    %c0_10 = arith.constant 0 : index
    %10 = vector.load %arg2[%c0_8, %9, %c0_9, %c0_10] : memref<1x8x2x96xf32, #tpu.memory_space<vmem>>, vector<1x1x2x96xf32>
    %11 = vector.shape_cast %10 : vector<1x1x2x96xf32> to vector<2x96xf32>
    %cst_11 = arith.constant dense<0.000000e+00> : vector<2x96xf32>
    %12 = tpu.matmul %5, %2, %cst_11 {dimension_numbers = #tpu.dot_dimension_numbers<[1], [0], [0], [1], [0, 0, 1, 1], [], []>} : vector<2x32xf32>, vector<32x96xf32>, vector<2x96xf32> -> vector<2x96xf32>
    %13 = vector.extract_strided_slice %11 {offsets = [0, 0], sizes = [2, 32], strides = [1, 1]} : vector<2x96xf32> to vector<2x32xf32>
    %14 = vector.extract_strided_slice %12 {offsets = [0, 0], sizes = [2, 32], strides = [1, 1]} : vector<2x96xf32> to vector<2x32xf32>
    %15 = arith.addf %13, %14 : vector<2x32xf32>
    %16 = arith.negf %15 : vector<2x32xf32>
    %17 = math.exp %16 : vector<2x32xf32>
    %cst_12 = arith.constant 1.000000e+00 : f32
    %18 = vector.broadcast %cst_12 : f32 to vector<2x32xf32>
    %19 = arith.addf %18, %17 : vector<2x32xf32>
    %20 = arith.divf %18, %19 : vector<2x32xf32>
    %21 = vector.extract_strided_slice %11 {offsets = [0, 32], sizes = [2, 32], strides = [1, 1]} : vector<2x96xf32> to vector<2x32xf32>
    %22 = vector.extract_strided_slice %12 {offsets = [0, 32], sizes = [2, 32], strides = [1, 1]} : vector<2x96xf32> to vector<2x32xf32>
    %23 = arith.addf %21, %22 : vector<2x32xf32>
    %24 = arith.negf %23 : vector<2x32xf32>
    %25 = math.exp %24 : vector<2x32xf32>
    %cst_13 = arith.constant 1.000000e+00 : f32
    %26 = vector.broadcast %cst_13 : f32 to vector<2x32xf32>
    %27 = arith.addf %26, %25 : vector<2x32xf32>
    %28 = arith.divf %26, %27 : vector<2x32xf32>
    %29 = vector.extract_strided_slice %11 {offsets = [0, 64], sizes = [2, 32], strides = [1, 1]} : vector<2x96xf32> to vector<2x32xf32>
    %30 = vector.extract_strided_slice %12 {offsets = [0, 64], sizes = [2, 32], strides = [1, 1]} : vector<2x96xf32> to vector<2x32xf32>
    %31 = vector.broadcast %4 : vector<1x32xf32> to vector<2x32xf32>
    %32 = arith.addf %30, %31 : vector<2x32xf32>
    %33 = arith.mulf %20, %32 : vector<2x32xf32>
    %34 = arith.addf %29, %33 : vector<2x32xf32>
    %35 = math.tanh %34 : vector<2x32xf32>
    %cst_14 = arith.constant 1.000000e+00 : f32
    %36 = vector.broadcast %cst_14 : f32 to vector<2x32xf32>
    %37 = arith.subf %36, %28 : vector<2x32xf32>
    %38 = arith.mulf %37, %35 : vector<2x32xf32>
    %39 = arith.mulf %28, %5 : vector<2x32xf32>
    %40 = arith.addf %38, %39 : vector<2x32xf32>
    %41 = vector.broadcast %8 : i32 to vector<2x1xi32>
    %42 = arith.cmpi sgt, %0, %41 : vector<2x1xi32>
    %43 = vector.shape_cast %42 : vector<2x1xi1> to vector<2x1xi1>
    %44 = vector.broadcast %43 : vector<2x1xi1> to vector<2x32xi1>
    %45 = arith.select %44, %40, %5 : vector<2x32xi1>, vector<2x32xf32>
    %cst_15 = arith.constant 0.000000e+00 : f32
    %46 = vector.shape_cast %42 : vector<2x1xi1> to vector<2x1xi1>
    %47 = vector.broadcast %46 : vector<2x1xi1> to vector<2x32xi1>
    %48 = vector.broadcast %cst_15 : f32 to vector<2x32xf32>
    %49 = arith.select %47, %45, %48 : vector<2x32xi1>, vector<2x32xf32>
    %c0_16 = arith.constant 0 : index
    %50 = arith.index_cast %8 : i32 to index
    %c0_17 = arith.constant 0 : index
    %c0_18 = arith.constant 0 : index
    %51 = vector.load %arg5[%c0_16, %50, %c0_17, %c0_18] : memref<1x8x2x32xf32, #tpu.memory_space<vmem>>, vector<1x1x2x32xf32>
    %52 = vector.shape_cast %51 : vector<1x1x2x32xf32> to vector<2x32xf32>
    %53 = vector.shape_cast %49 : vector<2x32xf32> to vector<1x1x2x32xf32>
    tpu.vector_store %arg5[%c0_16, %50, %c0_17, %c0_18], %53 {strides = array<i32>} : memref<1x8x2x32xf32, #tpu.memory_space<vmem>>, vector<1x1x2x32xf32>,
    %c1_i32 = arith.constant 1 : i32
    %c0_i32_19 = arith.constant 0 : i32
    %54 = arith.cmpi eq, %arg0, %c0_i32_19 : i32
    %c7_i32_20 = arith.constant 7 : i32
    %55 = arith.subi %c7_i32_20, %c1_i32 : i32
    %56 = arith.select %54, %c1_i32, %55 : i32
    %c0_21 = arith.constant 0 : index
    %57 = arith.index_cast %56 : i32 to index
    %c0_22 = arith.constant 0 : index
    %c0_23 = arith.constant 0 : index
    %58 = vector.load %arg2[%c0_21, %57, %c0_22, %c0_23] : memref<1x8x2x96xf32, #tpu.memory_space<vmem>>, vector<1x1x2x96xf32>
    %59 = vector.shape_cast %58 : vector<1x1x2x96xf32> to vector<2x96xf32>
    %cst_24 = arith.constant dense<0.000000e+00> : vector<2x96xf32>
    %60 = tpu.matmul %45, %2, %cst_24 {dimension_numbers = #tpu.dot_dimension_numbers<[1], [0], [0], [1], [0, 0, 1, 1], [], []>} : vector<2x32xf32>, vector<32x96xf32>, vector<2x96xf32> -> vector<2x96xf32>
    %61 = vector.extract_strided_slice %59 {offsets = [0, 0], sizes = [2, 32], strides = [1, 1]} : vector<2x96xf32> to vector<2x32xf32>
    %62 = vector.extract_strided_slice %60 {offsets = [0, 0], sizes = [2, 32], strides = [1, 1]} : vector<2x96xf32> to vector<2x32xf32>
    %63 = arith.addf %61, %62 : vector<2x32xf32>
    %64 = arith.negf %63 : vector<2x32xf32>
    %65 = math.exp %64 : vector<2x32xf32>
    %cst_25 = arith.constant 1.000000e+00 : f32
    %66 = vector.broadcast %cst_25 : f32 to vector<2x32xf32>
    %67 = arith.addf %66, %65 : vector<2x32xf32>
    %68 = arith.divf %66, %67 : vector<2x32xf32>
    %69 = vector.extract_strided_slice %59 {offsets = [0, 32], sizes = [2, 32], strides = [1, 1]} : vector<2x96xf32> to vector<2x32xf32>
    %70 = vector.extract_strided_slice %60 {offsets = [0, 32], sizes = [2, 32], strides = [1, 1]} : vector<2x96xf32> to vector<2x32xf32>
    %71 = arith.addf %69, %70 : vector<2x32xf32>
    %72 = arith.negf %71 : vector<2x32xf32>
    %73 = math.exp %72 : vector<2x32xf32>
    %cst_26 = arith.constant 1.000000e+00 : f32
    %74 = vector.broadcast %cst_26 : f32 to vector<2x32xf32>
    %75 = arith.addf %74, %73 : vector<2x32xf32>
    %76 = arith.divf %74, %75 : vector<2x32xf32>
    %77 = vector.extract_strided_slice %59 {offsets = [0, 64], sizes = [2, 32], strides = [1, 1]} : vector<2x96xf32> to vector<2x32xf32>
    %78 = vector.extract_strided_slice %60 {offsets = [0, 64], sizes = [2, 32], strides = [1, 1]} : vector<2x96xf32> to vector<2x32xf32>
    %79 = vector.broadcast %4 : vector<1x32xf32> to vector<2x32xf32>
    %80 = arith.addf %78, %79 : vector<2x32xf32>
    %81 = arith.mulf %68, %80 : vector<2x32xf32>
    %82 = arith.addf %77, %81 : vector<2x32xf32>
    %83 = math.tanh %82 : vector<2x32xf32>
    %cst_27 = arith.constant 1.000000e+00 : f32
    %84 = vector.broadcast %cst_27 : f32 to vector<2x32xf32>
    %85 = arith.subf %84, %76 : vector<2x32xf32>
    %86 = arith.mulf %85, %83 : vector<2x32xf32>
    %87 = arith.mulf %76, %45 : vector<2x32xf32>
    %88 = arith.addf %86, %87 : vector<2x32xf32>
    %89 = vector.broadcast %56 : i32 to vector<2x1xi32>
    %90 = arith.cmpi sgt, %0, %89 : vector<2x1xi32>
    %91 = vector.shape_cast %90 : vector<2x1xi1> to vector<2x1xi1>
    %92 = vector.broadcast %91 : vector<2x1xi1> to vector<2x32xi1>
    %93 = arith.select %92, %88, %45 : vector<2x32xi1>, vector<2x32xf32>
    %cst_28 = arith.constant 0.000000e+00 : f32
    %94 = vector.shape_cast %90 : vector<2x1xi1> to vector<2x1xi1>
    %95 = vector.broadcast %94 : vector<2x1xi1> to vector<2x32xi1>
    %96 = vector.broadcast %cst_28 : f32 to vector<2x32xf32>
    %97 = arith.select %95, %93, %96 : vector<2x32xi1>, vector<2x32xf32>
    %c0_29 = arith.constant 0 : index
    %98 = arith.index_cast %56 : i32 to index
    %c0_30 = arith.constant 0 : index
    %c0_31 = arith.constant 0 : index
    %99 = vector.load %arg5[%c0_29, %98, %c0_30, %c0_31] : memref<1x8x2x32xf32, #tpu.memory_space<vmem>>, vector<1x1x2x32xf32>
    %100 = vector.shape_cast %99 : vector<1x1x2x32xf32> to vector<2x32xf32>
    %101 = vector.shape_cast %97 : vector<2x32xf32> to vector<1x1x2x32xf32>
    tpu.vector_store %arg5[%c0_29, %98, %c0_30, %c0_31], %101 {strides = array<i32>} : memref<1x8x2x32xf32, #tpu.memory_space<vmem>>, vector<1x1x2x32xf32>,
    %c2_i32 = arith.constant 2 : i32
    %c0_i32_32 = arith.constant 0 : i32
    %102 = arith.cmpi eq, %arg0, %c0_i32_32 : i32
    %c7_i32_33 = arith.constant 7 : i32
    %103 = arith.subi %c7_i32_33, %c2_i32 : i32
    %104 = arith.select %102, %c2_i32, %103 : i32
    %c0_34 = arith.constant 0 : index
    %105 = arith.index_cast %104 : i32 to index
    %c0_35 = arith.constant 0 : index
    %c0_36 = arith.constant 0 : index
    %106 = vector.load %arg2[%c0_34, %105, %c0_35, %c0_36] : memref<1x8x2x96xf32, #tpu.memory_space<vmem>>, vector<1x1x2x96xf32>
    %107 = vector.shape_cast %106 : vector<1x1x2x96xf32> to vector<2x96xf32>
    %cst_37 = arith.constant dense<0.000000e+00> : vector<2x96xf32>
    %108 = tpu.matmul %93, %2, %cst_37 {dimension_numbers = #tpu.dot_dimension_numbers<[1], [0], [0], [1], [0, 0, 1, 1], [], []>} : vector<2x32xf32>, vector<32x96xf32>, vector<2x96xf32> -> vector<2x96xf32>
    %109 = vector.extract_strided_slice %107 {offsets = [0, 0], sizes = [2, 32], strides = [1, 1]} : vector<2x96xf32> to vector<2x32xf32>
    %110 = vector.extract_strided_slice %108 {offsets = [0, 0], sizes = [2, 32], strides = [1, 1]} : vector<2x96xf32> to vector<2x32xf32>
    %111 = arith.addf %109, %110 : vector<2x32xf32>
    %112 = arith.negf %111 : vector<2x32xf32>
    %113 = math.exp %112 : vector<2x32xf32>
    %cst_38 = arith.constant 1.000000e+00 : f32
    %114 = vector.broadcast %cst_38 : f32 to vector<2x32xf32>
    %115 = arith.addf %114, %113 : vector<2x32xf32>
    %116 = arith.divf %114, %115 : vector<2x32xf32>
    %117 = vector.extract_strided_slice %107 {offsets = [0, 32], sizes = [2, 32], strides = [1, 1]} : vector<2x96xf32> to vector<2x32xf32>
    %118 = vector.extract_strided_slice %108 {offsets = [0, 32], sizes = [2, 32], strides = [1, 1]} : vector<2x96xf32> to vector<2x32xf32>
    %119 = arith.addf %117, %118 : vector<2x32xf32>
    %120 = arith.negf %119 : vector<2x32xf32>
    %121 = math.exp %120 : vector<2x32xf32>
    %cst_39 = arith.constant 1.000000e+00 : f32
    %122 = vector.broadcast %cst_39 : f32 to vector<2x32xf32>
    %123 = arith.addf %122, %121 : vector<2x32xf32>
    %124 = arith.divf %122, %123 : vector<2x32xf32>
    %125 = vector.extract_strided_slice %107 {offsets = [0, 64], sizes = [2, 32], strides = [1, 1]} : vector<2x96xf32> to vector<2x32xf32>
    %126 = vector.extract_strided_slice %108 {offsets = [0, 64], sizes = [2, 32], strides = [1, 1]} : vector<2x96xf32> to vector<2x32xf32>
    %127 = vector.broadcast %4 : vector<1x32xf32> to vector<2x32xf32>
    %128 = arith.addf %126, %127 : vector<2x32xf32>
    %129 = arith.mulf %116, %128 : vector<2x32xf32>
    %130 = arith.addf %125, %129 : vector<2x32xf32>
    %131 = math.tanh %130 : vector<2x32xf32>
    %cst_40 = arith.constant 1.000000e+00 : f32
    %132 = vector.broadcast %cst_40 : f32 to vector<2x32xf32>
    %133 = arith.subf %132, %124 : vector<2x32xf32>
    %134 = arith.mulf %133, %131 : vector<2x32xf32>
    %135 = arith.mulf %124, %93 : vector<2x32xf32>
    %136 = arith.addf %134, %135 : vector<2x32xf32>
    %137 = vector.broadcast %104 : i32 to vector<2x1xi32>
    %138 = arith.cmpi sgt, %0, %137 : vector<2x1xi32>
    %139 = vector.shape_cast %138 : vector<2x1xi1> to vector<2x1xi1>
    %140 = vector.broadcast %139 : vector<2x1xi1> to vector<2x32xi1>
    %141 = arith.select %140, %136, %93 : vector<2x32xi1>, vector<2x32xf32>
    %cst_41 = arith.constant 0.000000e+00 : f32
    %142 = vector.shape_cast %138 : vector<2x1xi1> to vector<2x1xi1>
    %143 = vector.broadcast %142 : vector<2x1xi1> to vector<2x32xi1>
    %144 = vector.broadcast %cst_41 : f32 to vector<2x32xf32>
    %145 = arith.select %143, %141, %144 : vector<2x32xi1>, vector<2x32xf32>
    %c0_42 = arith.constant 0 : index
    %146 = arith.index_cast %104 : i32 to index
    %c0_43 = arith.constant 0 : index
    %c0_44 = arith.constant 0 : index
    %147 = vector.load %arg5[%c0_42, %146, %c0_43, %c0_44] : memref<1x8x2x32xf32, #tpu.memory_space<vmem>>, vector<1x1x2x32xf32>
    %148 = vector.shape_cast %147 : vector<1x1x2x32xf32> to vector<2x32xf32>
    %149 = vector.shape_cast %145 : vector<2x32xf32> to vector<1x1x2x32xf32>
    tpu.vector_store %arg5[%c0_42, %146, %c0_43, %c0_44], %149 {strides = array<i32>} : memref<1x8x2x32xf32, #tpu.memory_space<vmem>>, vector<1x1x2x32xf32>,
    %c3_i32 = arith.constant 3 : i32
    %c0_i32_45 = arith.constant 0 : i32
    %150 = arith.cmpi eq, %arg0, %c0_i32_45 : i32
    %c7_i32_46 = arith.constant 7 : i32
    %151 = arith.subi %c7_i32_46, %c3_i32 : i32
    %152 = arith.select %150, %c3_i32, %151 : i32
    %c0_47 = arith.constant 0 : index
    %153 = arith.index_cast %152 : i32 to index
    %c0_48 = arith.constant 0 : index
    %c0_49 = arith.constant 0 : index
    %154 = vector.load %arg2[%c0_47, %153, %c0_48, %c0_49] : memref<1x8x2x96xf32, #tpu.memory_space<vmem>>, vector<1x1x2x96xf32>
    %155 = vector.shape_cast %154 : vector<1x1x2x96xf32> to vector<2x96xf32>
    %cst_50 = arith.constant dense<0.000000e+00> : vector<2x96xf32>
    %156 = tpu.matmul %141, %2, %cst_50 {dimension_numbers = #tpu.dot_dimension_numbers<[1], [0], [0], [1], [0, 0, 1, 1], [], []>} : vector<2x32xf32>, vector<32x96xf32>, vector<2x96xf32> -> vector<2x96xf32>
    %157 = vector.extract_strided_slice %155 {offsets = [0, 0], sizes = [2, 32], strides = [1, 1]} : vector<2x96xf32> to vector<2x32xf32>
    %158 = vector.extract_strided_slice %156 {offsets = [0, 0], sizes = [2, 32], strides = [1, 1]} : vector<2x96xf32> to vector<2x32xf32>
    %159 = arith.addf %157, %158 : vector<2x32xf32>
    %160 = arith.negf %159 : vector<2x32xf32>
    %161 = math.exp %160 : vector<2x32xf32>
    %cst_51 = arith.constant 1.000000e+00 : f32
    %162 = vector.broadcast %cst_51 : f32 to vector<2x32xf32>
    %163 = arith.addf %162, %161 : vector<2x32xf32>
    %164 = arith.divf %162, %163 : vector<2x32xf32>
    %165 = vector.extract_strided_slice %155 {offsets = [0, 32], sizes = [2, 32], strides = [1, 1]} : vector<2x96xf32> to vector<2x32xf32>
    %166 = vector.extract_strided_slice %156 {offsets = [0, 32], sizes = [2, 32], strides = [1, 1]} : vector<2x96xf32> to vector<2x32xf32>
    %167 = arith.addf %165, %166 : vector<2x32xf32>
    %168 = arith.negf %167 : vector<2x32xf32>
    %169 = math.exp %168 : vector<2x32xf32>
    %cst_52 = arith.constant 1.000000e+00 : f32
    %170 = vector.broadcast %cst_52 : f32 to vector<2x32xf32>
    %171 = arith.addf %170, %169 : vector<2x32xf32>
    %172 = arith.divf %170, %171 : vector<2x32xf32>
    %173 = vector.extract_strided_slice %155 {offsets = [0, 64], sizes = [2, 32], strides = [1, 1]} : vector<2x96xf32> to vector<2x32xf32>
    %174 = vector.extract_strided_slice %156 {offsets = [0, 64], sizes = [2, 32], strides = [1, 1]} : vector<2x96xf32> to vector<2x32xf32>
    %175 = vector.broadcast %4 : vector<1x32xf32> to vector<2x32xf32>
    %176 = arith.addf %174, %175 : vector<2x32xf32>
    %177 = arith.mulf %164, %176 : vector<2x32xf32>
    %178 = arith.addf %173, %177 : vector<2x32xf32>
    %179 = math.tanh %178 : vector<2x32xf32>
    %cst_53 = arith.constant 1.000000e+00 : f32
    %180 = vector.broadcast %cst_53 : f32 to vector<2x32xf32>
    %181 = arith.subf %180, %172 : vector<2x32xf32>
    %182 = arith.mulf %181, %179 : vector<2x32xf32>
    %183 = arith.mulf %172, %141 : vector<2x32xf32>
    %184 = arith.addf %182, %183 : vector<2x32xf32>
    %185 = vector.broadcast %152 : i32 to vector<2x1xi32>
    %186 = arith.cmpi sgt, %0, %185 : vector<2x1xi32>
    %187 = vector.shape_cast %186 : vector<2x1xi1> to vector<2x1xi1>
    %188 = vector.broadcast %187 : vector<2x1xi1> to vector<2x32xi1>
    %189 = arith.select %188, %184, %141 : vector<2x32xi1>, vector<2x32xf32>
    %cst_54 = arith.constant 0.000000e+00 : f32
    %190 = vector.shape_cast %186 : vector<2x1xi1> to vector<2x1xi1>
    %191 = vector.broadcast %190 : vector<2x1xi1> to vector<2x32xi1>
    %192 = vector.broadcast %cst_54 : f32 to vector<2x32xf32>
    %193 = arith.select %191, %189, %192 : vector<2x32xi1>, vector<2x32xf32>
    %c0_55 = arith.constant 0 : index
    %194 = arith.index_cast %152 : i32 to index
    %c0_56 = arith.constant 0 : index
    %c0_57 = arith.constant 0 : index
    %195 = vector.load %arg5[%c0_55, %194, %c0_56, %c0_57] : memref<1x8x2x32xf32, #tpu.memory_space<vmem>>, vector<1x1x2x32xf32>
    %196 = vector.shape_cast %195 : vector<1x1x2x32xf32> to vector<2x32xf32>
    %197 = vector.shape_cast %193 : vector<2x32xf32> to vector<1x1x2x32xf32>
    tpu.vector_store %arg5[%c0_55, %194, %c0_56, %c0_57], %197 {strides = array<i32>} : memref<1x8x2x32xf32, #tpu.memory_space<vmem>>, vector<1x1x2x32xf32>,
    %c4_i32 = arith.constant 4 : i32
    %c0_i32_58 = arith.constant 0 : i32
    %198 = arith.cmpi eq, %arg0, %c0_i32_58 : i32
    %c7_i32_59 = arith.constant 7 : i32
    %199 = arith.subi %c7_i32_59, %c4_i32 : i32
    %200 = arith.select %198, %c4_i32, %199 : i32
    %c0_60 = arith.constant 0 : index
    %201 = arith.index_cast %200 : i32 to index
    %c0_61 = arith.constant 0 : index
    %c0_62 = arith.constant 0 : index
    %202 = vector.load %arg2[%c0_60, %201, %c0_61, %c0_62] : memref<1x8x2x96xf32, #tpu.memory_space<vmem>>, vector<1x1x2x96xf32>
    %203 = vector.shape_cast %202 : vector<1x1x2x96xf32> to vector<2x96xf32>
    %cst_63 = arith.constant dense<0.000000e+00> : vector<2x96xf32>
    %204 = tpu.matmul %189, %2, %cst_63 {dimension_numbers = #tpu.dot_dimension_numbers<[1], [0], [0], [1], [0, 0, 1, 1], [], []>} : vector<2x32xf32>, vector<32x96xf32>, vector<2x96xf32> -> vector<2x96xf32>
    %205 = vector.extract_strided_slice %203 {offsets = [0, 0], sizes = [2, 32], strides = [1, 1]} : vector<2x96xf32> to vector<2x32xf32>
    %206 = vector.extract_strided_slice %204 {offsets = [0, 0], sizes = [2, 32], strides = [1, 1]} : vector<2x96xf32> to vector<2x32xf32>
    %207 = arith.addf %205, %206 : vector<2x32xf32>
    %208 = arith.negf %207 : vector<2x32xf32>
    %209 = math.exp %208 : vector<2x32xf32>
    %cst_64 = arith.constant 1.000000e+00 : f32
    %210 = vector.broadcast %cst_64 : f32 to vector<2x32xf32>
    %211 = arith.addf %210, %209 : vector<2x32xf32>
    %212 = arith.divf %210, %211 : vector<2x32xf32>
    %213 = vector.extract_strided_slice %203 {offsets = [0, 32], sizes = [2, 32], strides = [1, 1]} : vector<2x96xf32> to vector<2x32xf32>
    %214 = vector.extract_strided_slice %204 {offsets = [0, 32], sizes = [2, 32], strides = [1, 1]} : vector<2x96xf32> to vector<2x32xf32>
    %215 = arith.addf %213, %214 : vector<2x32xf32>
    %216 = arith.negf %215 : vector<2x32xf32>
    %217 = math.exp %216 : vector<2x32xf32>
    %cst_65 = arith.constant 1.000000e+00 : f32
    %218 = vector.broadcast %cst_65 : f32 to vector<2x32xf32>
    %219 = arith.addf %218, %217 : vector<2x32xf32>
    %220 = arith.divf %218, %219 : vector<2x32xf32>
    %221 = vector.extract_strided_slice %203 {offsets = [0, 64], sizes = [2, 32], strides = [1, 1]} : vector<2x96xf32> to vector<2x32xf32>
    %222 = vector.extract_strided_slice %204 {offsets = [0, 64], sizes = [2, 32], strides = [1, 1]} : vector<2x96xf32> to vector<2x32xf32>
    %223 = vector.broadcast %4 : vector<1x32xf32> to vector<2x32xf32>
    %224 = arith.addf %222, %223 : vector<2x32xf32>
    %225 = arith.mulf %212, %224 : vector<2x32xf32>
    %226 = arith.addf %221, %225 : vector<2x32xf32>
    %227 = math.tanh %226 : vector<2x32xf32>
    %cst_66 = arith.constant 1.000000e+00 : f32
    %228 = vector.broadcast %cst_66 : f32 to vector<2x32xf32>
    %229 = arith.subf %228, %220 : vector<2x32xf32>
    %230 = arith.mulf %229, %227 : vector<2x32xf32>
    %231 = arith.mulf %220, %189 : vector<2x32xf32>
    %232 = arith.addf %230, %231 : vector<2x32xf32>
    %233 = vector.broadcast %200 : i32 to vector<2x1xi32>
    %234 = arith.cmpi sgt, %0, %233 : vector<2x1xi32>
    %235 = vector.shape_cast %234 : vector<2x1xi1> to vector<2x1xi1>
    %236 = vector.broadcast %235 : vector<2x1xi1> to vector<2x32xi1>
    %237 = arith.select %236, %232, %189 : vector<2x32xi1>, vector<2x32xf32>
    %cst_67 = arith.constant 0.000000e+00 : f32
    %238 = vector.shape_cast %234 : vector<2x1xi1> to vector<2x1xi1>
    %239 = vector.broadcast %238 : vector<2x1xi1> to vector<2x32xi1>
    %240 = vector.broadcast %cst_67 : f32 to vector<2x32xf32>
    %241 = arith.select %239, %237, %240 : vector<2x32xi1>, vector<2x32xf32>
    %c0_68 = arith.constant 0 : index
    %242 = arith.index_cast %200 : i32 to index
    %c0_69 = arith.constant 0 : index
    %c0_70 = arith.constant 0 : index
    %243 = vector.load %arg5[%c0_68, %242, %c0_69, %c0_70] : memref<1x8x2x32xf32, #tpu.memory_space<vmem>>, vector<1x1x2x32xf32>
    %244 = vector.shape_cast %243 : vector<1x1x2x32xf32> to vector<2x32xf32>
    %245 = vector.shape_cast %241 : vector<2x32xf32> to vector<1x1x2x32xf32>
    tpu.vector_store %arg5[%c0_68, %242, %c0_69, %c0_70], %245 {strides = array<i32>} : memref<1x8x2x32xf32, #tpu.memory_space<vmem>>, vector<1x1x2x32xf32>,
    %c5_i32 = arith.constant 5 : i32
    %c0_i32_71 = arith.constant 0 : i32
    %246 = arith.cmpi eq, %arg0, %c0_i32_71 : i32
    %c7_i32_72 = arith.constant 7 : i32
    %247 = arith.subi %c7_i32_72, %c5_i32 : i32
    %248 = arith.select %246, %c5_i32, %247 : i32
    %c0_73 = arith.constant 0 : index
    %249 = arith.index_cast %248 : i32 to index
    %c0_74 = arith.constant 0 : index
    %c0_75 = arith.constant 0 : index
    %250 = vector.load %arg2[%c0_73, %249, %c0_74, %c0_75] : memref<1x8x2x96xf32, #tpu.memory_space<vmem>>, vector<1x1x2x96xf32>
    %251 = vector.shape_cast %250 : vector<1x1x2x96xf32> to vector<2x96xf32>
    %cst_76 = arith.constant dense<0.000000e+00> : vector<2x96xf32>
    %252 = tpu.matmul %237, %2, %cst_76 {dimension_numbers = #tpu.dot_dimension_numbers<[1], [0], [0], [1], [0, 0, 1, 1], [], []>} : vector<2x32xf32>, vector<32x96xf32>, vector<2x96xf32> -> vector<2x96xf32>
    %253 = vector.extract_strided_slice %251 {offsets = [0, 0], sizes = [2, 32], strides = [1, 1]} : vector<2x96xf32> to vector<2x32xf32>
    %254 = vector.extract_strided_slice %252 {offsets = [0, 0], sizes = [2, 32], strides = [1, 1]} : vector<2x96xf32> to vector<2x32xf32>
    %255 = arith.addf %253, %254 : vector<2x32xf32>
    %256 = arith.negf %255 : vector<2x32xf32>
    %257 = math.exp %256 : vector<2x32xf32>
    %cst_77 = arith.constant 1.000000e+00 : f32
    %258 = vector.broadcast %cst_77 : f32 to vector<2x32xf32>
    %259 = arith.addf %258, %257 : vector<2x32xf32>
    %260 = arith.divf %258, %259 : vector<2x32xf32>
    %261 = vector.extract_strided_slice %251 {offsets = [0, 32], sizes = [2, 32], strides = [1, 1]} : vector<2x96xf32> to vector<2x32xf32>
    %262 = vector.extract_strided_slice %252 {offsets = [0, 32], sizes = [2, 32], strides = [1, 1]} : vector<2x96xf32> to vector<2x32xf32>
    %263 = arith.addf %261, %262 : vector<2x32xf32>
    %264 = arith.negf %263 : vector<2x32xf32>
    %265 = math.exp %264 : vector<2x32xf32>
    %cst_78 = arith.constant 1.000000e+00 : f32
    %266 = vector.broadcast %cst_78 : f32 to vector<2x32xf32>
    %267 = arith.addf %266, %265 : vector<2x32xf32>
    %268 = arith.divf %266, %267 : vector<2x32xf32>
    %269 = vector.extract_strided_slice %251 {offsets = [0, 64], sizes = [2, 32], strides = [1, 1]} : vector<2x96xf32> to vector<2x32xf32>
    %270 = vector.extract_strided_slice %252 {offsets = [0, 64], sizes = [2, 32], strides = [1, 1]} : vector<2x96xf32> to vector<2x32xf32>
    %271 = vector.broadcast %4 : vector<1x32xf32> to vector<2x32xf32>
    %272 = arith.addf %270, %271 : vector<2x32xf32>
    %273 = arith.mulf %260, %272 : vector<2x32xf32>
    %274 = arith.addf %269, %273 : vector<2x32xf32>
    %275 = math.tanh %274 : vector<2x32xf32>
    %cst_79 = arith.constant 1.000000e+00 : f32
    %276 = vector.broadcast %cst_79 : f32 to vector<2x32xf32>
    %277 = arith.subf %276, %268 : vector<2x32xf32>
    %278 = arith.mulf %277, %275 : vector<2x32xf32>
    %279 = arith.mulf %268, %237 : vector<2x32xf32>
    %280 = arith.addf %278, %279 : vector<2x32xf32>
    %281 = vector.broadcast %248 : i32 to vector<2x1xi32>
    %282 = arith.cmpi sgt, %0, %281 : vector<2x1xi32>
    %283 = vector.shape_cast %282 : vector<2x1xi1> to vector<2x1xi1>
    %284 = vector.broadcast %283 : vector<2x1xi1> to vector<2x32xi1>
    %285 = arith.select %284, %280, %237 : vector<2x32xi1>, vector<2x32xf32>
    %cst_80 = arith.constant 0.000000e+00 : f32
    %286 = vector.shape_cast %282 : vector<2x1xi1> to vector<2x1xi1>
    %287 = vector.broadcast %286 : vector<2x1xi1> to vector<2x32xi1>
    %288 = vector.broadcast %cst_80 : f32 to vector<2x32xf32>
    %289 = arith.select %287, %285, %288 : vector<2x32xi1>, vector<2x32xf32>
    %c0_81 = arith.constant 0 : index
    %290 = arith.index_cast %248 : i32 to index
    %c0_82 = arith.constant 0 : index
    %c0_83 = arith.constant 0 : index
    %291 = vector.load %arg5[%c0_81, %290, %c0_82, %c0_83] : memref<1x8x2x32xf32, #tpu.memory_space<vmem>>, vector<1x1x2x32xf32>
    %292 = vector.shape_cast %291 : vector<1x1x2x32xf32> to vector<2x32xf32>
    %293 = vector.shape_cast %289 : vector<2x32xf32> to vector<1x1x2x32xf32>
    tpu.vector_store %arg5[%c0_81, %290, %c0_82, %c0_83], %293 {strides = array<i32>} : memref<1x8x2x32xf32, #tpu.memory_space<vmem>>, vector<1x1x2x32xf32>,
    %c6_i32 = arith.constant 6 : i32
    %c0_i32_84 = arith.constant 0 : i32
    %294 = arith.cmpi eq, %arg0, %c0_i32_84 : i32
    %c7_i32_85 = arith.constant 7 : i32
    %295 = arith.subi %c7_i32_85, %c6_i32 : i32
    %296 = arith.select %294, %c6_i32, %295 : i32
    %c0_86 = arith.constant 0 : index
    %297 = arith.index_cast %296 : i32 to index
    %c0_87 = arith.constant 0 : index
    %c0_88 = arith.constant 0 : index
    %298 = vector.load %arg2[%c0_86, %297, %c0_87, %c0_88] : memref<1x8x2x96xf32, #tpu.memory_space<vmem>>, vector<1x1x2x96xf32>
    %299 = vector.shape_cast %298 : vector<1x1x2x96xf32> to vector<2x96xf32>
    %cst_89 = arith.constant dense<0.000000e+00> : vector<2x96xf32>
    %300 = tpu.matmul %285, %2, %cst_89 {dimension_numbers = #tpu.dot_dimension_numbers<[1], [0], [0], [1], [0, 0, 1, 1], [], []>} : vector<2x32xf32>, vector<32x96xf32>, vector<2x96xf32> -> vector<2x96xf32>
    %301 = vector.extract_strided_slice %299 {offsets = [0, 0], sizes = [2, 32], strides = [1, 1]} : vector<2x96xf32> to vector<2x32xf32>
    %302 = vector.extract_strided_slice %300 {offsets = [0, 0], sizes = [2, 32], strides = [1, 1]} : vector<2x96xf32> to vector<2x32xf32>
    %303 = arith.addf %301, %302 : vector<2x32xf32>
    %304 = arith.negf %303 : vector<2x32xf32>
    %305 = math.exp %304 : vector<2x32xf32>
    %cst_90 = arith.constant 1.000000e+00 : f32
    %306 = vector.broadcast %cst_90 : f32 to vector<2x32xf32>
    %307 = arith.addf %306, %305 : vector<2x32xf32>
    %308 = arith.divf %306, %307 : vector<2x32xf32>
    %309 = vector.extract_strided_slice %299 {offsets = [0, 32], sizes = [2, 32], strides = [1, 1]} : vector<2x96xf32> to vector<2x32xf32>
    %310 = vector.extract_strided_slice %300 {offsets = [0, 32], sizes = [2, 32], strides = [1, 1]} : vector<2x96xf32> to vector<2x32xf32>
    %311 = arith.addf %309, %310 : vector<2x32xf32>
    %312 = arith.negf %311 : vector<2x32xf32>
    %313 = math.exp %312 : vector<2x32xf32>
    %cst_91 = arith.constant 1.000000e+00 : f32
    %314 = vector.broadcast %cst_91 : f32 to vector<2x32xf32>
    %315 = arith.addf %314, %313 : vector<2x32xf32>
    %316 = arith.divf %314, %315 : vector<2x32xf32>
    %317 = vector.extract_strided_slice %299 {offsets = [0, 64], sizes = [2, 32], strides = [1, 1]} : vector<2x96xf32> to vector<2x32xf32>
    %318 = vector.extract_strided_slice %300 {offsets = [0, 64], sizes = [2, 32], strides = [1, 1]} : vector<2x96xf32> to vector<2x32xf32>
    %319 = vector.broadcast %4 : vector<1x32xf32> to vector<2x32xf32>
    %320 = arith.addf %318, %319 : vector<2x32xf32>
    %321 = arith.mulf %308, %320 : vector<2x32xf32>
    %322 = arith.addf %317, %321 : vector<2x32xf32>
    %323 = math.tanh %322 : vector<2x32xf32>
    %cst_92 = arith.constant 1.000000e+00 : f32
    %324 = vector.broadcast %cst_92 : f32 to vector<2x32xf32>
    %325 = arith.subf %324, %316 : vector<2x32xf32>
    %326 = arith.mulf %325, %323 : vector<2x32xf32>
    %327 = arith.mulf %316, %285 : vector<2x32xf32>
    %328 = arith.addf %326, %327 : vector<2x32xf32>
    %329 = vector.broadcast %296 : i32 to vector<2x1xi32>
    %330 = arith.cmpi sgt, %0, %329 : vector<2x1xi32>
    %331 = vector.shape_cast %330 : vector<2x1xi1> to vector<2x1xi1>
    %332 = vector.broadcast %331 : vector<2x1xi1> to vector<2x32xi1>
    %333 = arith.select %332, %328, %285 : vector<2x32xi1>, vector<2x32xf32>
    %cst_93 = arith.constant 0.000000e+00 : f32
    %334 = vector.shape_cast %330 : vector<2x1xi1> to vector<2x1xi1>
    %335 = vector.broadcast %334 : vector<2x1xi1> to vector<2x32xi1>
    %336 = vector.broadcast %cst_93 : f32 to vector<2x32xf32>
    %337 = arith.select %335, %333, %336 : vector<2x32xi1>, vector<2x32xf32>
    %c0_94 = arith.constant 0 : index
    %338 = arith.index_cast %296 : i32 to index
    %c0_95 = arith.constant 0 : index
    %c0_96 = arith.constant 0 : index
    %339 = vector.load %arg5[%c0_94, %338, %c0_95, %c0_96] : memref<1x8x2x32xf32, #tpu.memory_space<vmem>>, vector<1x1x2x32xf32>
    %340 = vector.shape_cast %339 : vector<1x1x2x32xf32> to vector<2x32xf32>
    %341 = vector.shape_cast %337 : vector<2x32xf32> to vector<1x1x2x32xf32>
    tpu.vector_store %arg5[%c0_94, %338, %c0_95, %c0_96], %341 {strides = array<i32>} : memref<1x8x2x32xf32, #tpu.memory_space<vmem>>, vector<1x1x2x32xf32>,
    %c7_i32_97 = arith.constant 7 : i32
    %c0_i32_98 = arith.constant 0 : i32
    %342 = arith.cmpi eq, %arg0, %c0_i32_98 : i32
    %c7_i32_99 = arith.constant 7 : i32
    %343 = arith.subi %c7_i32_99, %c7_i32_97 : i32
    %344 = arith.select %342, %c7_i32_97, %343 : i32
    %c0_100 = arith.constant 0 : index
    %345 = arith.index_cast %344 : i32 to index
    %c0_101 = arith.constant 0 : index
    %c0_102 = arith.constant 0 : index
    %346 = vector.load %arg2[%c0_100, %345, %c0_101, %c0_102] : memref<1x8x2x96xf32, #tpu.memory_space<vmem>>, vector<1x1x2x96xf32>
    %347 = vector.shape_cast %346 : vector<1x1x2x96xf32> to vector<2x96xf32>
    %cst_103 = arith.constant dense<0.000000e+00> : vector<2x96xf32>
    %348 = tpu.matmul %333, %2, %cst_103 {dimension_numbers = #tpu.dot_dimension_numbers<[1], [0], [0], [1], [0, 0, 1, 1], [], []>} : vector<2x32xf32>, vector<32x96xf32>, vector<2x96xf32> -> vector<2x96xf32>
    %349 = vector.extract_strided_slice %347 {offsets = [0, 0], sizes = [2, 32], strides = [1, 1]} : vector<2x96xf32> to vector<2x32xf32>
    %350 = vector.extract_strided_slice %348 {offsets = [0, 0], sizes = [2, 32], strides = [1, 1]} : vector<2x96xf32> to vector<2x32xf32>
    %351 = arith.addf %349, %350 : vector<2x32xf32>
    %352 = arith.negf %351 : vector<2x32xf32>
    %353 = math.exp %352 : vector<2x32xf32>
    %cst_104 = arith.constant 1.000000e+00 : f32
    %354 = vector.broadcast %cst_104 : f32 to vector<2x32xf32>
    %355 = arith.addf %354, %353 : vector<2x32xf32>
    %356 = arith.divf %354, %355 : vector<2x32xf32>
    %357 = vector.extract_strided_slice %347 {offsets = [0, 32], sizes = [2, 32], strides = [1, 1]} : vector<2x96xf32> to vector<2x32xf32>
    %358 = vector.extract_strided_slice %348 {offsets = [0, 32], sizes = [2, 32], strides = [1, 1]} : vector<2x96xf32> to vector<2x32xf32>
    %359 = arith.addf %357, %358 : vector<2x32xf32>
    %360 = arith.negf %359 : vector<2x32xf32>
    %361 = math.exp %360 : vector<2x32xf32>
    %cst_105 = arith.constant 1.000000e+00 : f32
    %362 = vector.broadcast %cst_105 : f32 to vector<2x32xf32>
    %363 = arith.addf %362, %361 : vector<2x32xf32>
    %364 = arith.divf %362, %363 : vector<2x32xf32>
    %365 = vector.extract_strided_slice %347 {offsets = [0, 64], sizes = [2, 32], strides = [1, 1]} : vector<2x96xf32> to vector<2x32xf32>
    %366 = vector.extract_strided_slice %348 {offsets = [0, 64], sizes = [2, 32], strides = [1, 1]} : vector<2x96xf32> to vector<2x32xf32>
    %367 = vector.broadcast %4 : vector<1x32xf32> to vector<2x32xf32>
    %368 = arith.addf %366, %367 : vector<2x32xf32>
    %369 = arith.mulf %356, %368 : vector<2x32xf32>
    %370 = arith.addf %365, %369 : vector<2x32xf32>
    %371 = math.tanh %370 : vector<2x32xf32>
    %cst_106 = arith.constant 1.000000e+00 : f32
    %372 = vector.broadcast %cst_106 : f32 to vector<2x32xf32>
    %373 = arith.subf %372, %364 : vector<2x32xf32>
    %374 = arith.mulf %373, %371 : vector<2x32xf32>
    %375 = arith.mulf %364, %333 : vector<2x32xf32>
    %376 = arith.addf %374, %375 : vector<2x32xf32>
    %377 = vector.broadcast %344 : i32 to vector<2x1xi32>
    %378 = arith.cmpi sgt, %0, %377 : vector<2x1xi32>
    %379 = vector.shape_cast %378 : vector<2x1xi1> to vector<2x1xi1>
    %380 = vector.broadcast %379 : vector<2x1xi1> to vector<2x32xi1>
    %381 = arith.select %380, %376, %333 : vector<2x32xi1>, vector<2x32xf32>
    %cst_107 = arith.constant 0.000000e+00 : f32
    %382 = vector.shape_cast %378 : vector<2x1xi1> to vector<2x1xi1>
    %383 = vector.broadcast %382 : vector<2x1xi1> to vector<2x32xi1>
    %384 = vector.broadcast %cst_107 : f32 to vector<2x32xf32>
    %385 = arith.select %383, %381, %384 : vector<2x32xi1>, vector<2x32xf32>
    %c0_108 = arith.constant 0 : index
    %386 = arith.index_cast %344 : i32 to index
    %c0_109 = arith.constant 0 : index
    %c0_110 = arith.constant 0 : index
    %387 = vector.load %arg5[%c0_108, %386, %c0_109, %c0_110] : memref<1x8x2x32xf32, #tpu.memory_space<vmem>>, vector<1x1x2x32xf32>
    %388 = vector.shape_cast %387 : vector<1x1x2x32xf32> to vector<2x32xf32>
    %389 = vector.shape_cast %385 : vector<2x32xf32> to vector<1x1x2x32xf32>
    tpu.vector_store %arg5[%c0_108, %386, %c0_109, %c0_110], %389 {strides = array<i32>} : memref<1x8x2x32xf32, #tpu.memory_space<vmem>>, vector<1x1x2x32xf32>,
    %c8_i32 = arith.constant 8 : i32
    %c0_111 = arith.constant 0 : index
    %c0_112 = arith.constant 0 : index
    %c0_113 = arith.constant 0 : index
    %390 = vector.load %arg6[%c0_111, %c0_112, %c0_113] : memref<1x2x32xf32, #tpu.memory_space<vmem>>, vector<1x2x32xf32>
    %391 = vector.shape_cast %390 : vector<1x2x32xf32> to vector<2x32xf32>
    %392 = vector.shape_cast %381 : vector<2x32xf32> to vector<1x2x32xf32>
    tpu.vector_store %arg6[%c0_111, %c0_112, %c0_113], %392 {strides = array<i32>} : memref<1x2x32xf32, #tpu.memory_space<vmem>>, vector<1x2x32xf32>,
    return
  }
  func.func @transform_0(%arg0: i32) -> (i32, i32) {
    %c0_i32 = arith.constant 0 : i32
    %c0_i32_0 = arith.constant 0 : i32
    %c0_i32_1 = arith.constant 0 : i32
    return %c0_i32, %c0_i32_0 : i32, i32
  }
  func.func @transform_1(%arg0: i32) -> (i32, i32, i32, i32) {
    %c0_i32 = arith.constant 0 : i32
    %c0_i32_0 = arith.constant 0 : i32
    %c0_i32_1 = arith.constant 0 : i32
    %c0_i32_2 = arith.constant 0 : i32
    return %arg0, %c0_i32, %c0_i32_0, %c0_i32_1 : i32, i32, i32, i32
  }
  func.func @transform_2(%arg0: i32) -> (i32, i32, i32) {
    %c0_i32 = arith.constant 0 : i32
    %c0_i32_0 = arith.constant 0 : i32
    %c0_i32_1 = arith.constant 0 : i32
    return %arg0, %c0_i32, %c0_i32_0 : i32, i32, i32
  }
  func.func @transform_3(%arg0: i32) -> (i32, i32, i32) {
    %c0_i32 = arith.constant 0 : i32
    %c0_i32_0 = arith.constant 0 : i32
    %c0_i32_1 = arith.constant 0 : i32
    return %arg0, %c0_i32, %c0_i32_0 : i32, i32, i32
  }
  func.func @transform_4(%arg0: i32) -> (i32, i32, i32, i32) {
    %c0_i32 = arith.constant 0 : i32
    %c0_i32_0 = arith.constant 0 : i32
    %c0_i32_1 = arith.constant 0 : i32
    %c0_i32_2 = arith.constant 0 : i32
    return %arg0, %c0_i32, %c0_i32_0, %c0_i32_1 : i32, i32, i32, i32
  }
  func.func @transform_5(%arg0: i32) -> (i32, i32, i32) {
    %c0_i32 = arith.constant 0 : i32
    %c0_i32_0 = arith.constant 0 : i32
    %c0_i32_1 = arith.constant 0 : i32
    return %arg0, %c0_i32, %c0_i32_0 : i32, i32, i32
  }
}

</mosaic_0001>

<bundles_post_ra>
// kernel: instruction_embedding_forward.3
= control target key start
LH: loop header
LB: loop body
LE: loop exit
PB: predicated region body
PF: predicated region fallthrough
CT: control target
= control target key end

     0   :  { %s2208_s0 = inlined_call_operand.vmem [shape: s32[2,1], index: 0, kind: input, shape index: {}]   ;;  %s2209_s1 = inlined_call_operand.vmem [shape: f32[2,8,2,96], index: 1, kind: input, shape index: {}]   ;;  %s2210_s2 = inlined_call_operand.vmem [shape: f32[2,32,96], index: 2, kind: input, shape index: {}]   ;;  %s2211_s3 = inlined_call_operand.vmem [shape: f32[2,1,32], index: 3, kind: input, shape index: {}]   ;;  %s2212_s4 = inlined_call_operand.hbm [shape: f32[2,8,2,32], index: 4, kind: output, shape index: {0}]   ;;  %s2213_s5 = inlined_call_operand.vmem [shape: f32[2,2,32], index: 5, kind: output, shape index: {1}]  }
   0x1   :  { %2221 = sst [smem:[#allocation5_spill]] %s2208_s0 }
   0x2   :  { %2222 = sst [smem:[#allocation6_spill]] %s2209_s1 }
   0x3   :  { %11 = vsyncpa [#allocation3], 0 }
   0x4   :  { %13 = vsyncpa [#allocation3 + $0x1], 0  ;;  %s1830_s18 = smov 0   ;;  %s1832_s19 = smov 0  }
   0x5   :  { %s1834_s20 = smov 0   ;;  %s1836_s21 = smov 0  }
   0x6 LB: > { %s1851_s22 = sadd.s32 4294967295, %s1789_s21   ;;  %s1412_s23 = sadd.s32 4294967294, %s1789_s21   ;;  %s1789_s21 = sphi %s1836_s21, %s2236_s21   ;;  %s1785_s20 = sphi %s1834_s20, %s2235_s20   ;;  %s1781_s19 = sphi %s1832_s19, %s2234_s19   ;;  %s1777_s18 = sphi %s1830_s18, %s2233_s18  }
   0x7   : > { %s1855_s24 = sadd.s32 1, %s1789_s21   ;;  %s125_s25 = sadd.s32 1, %s1785_s20 }
   0x8   : > { %s122_s26 = ssub.s32 %s1789_s21, %s1855_s24  ;;  %p135_p0 = scmp.ne.s32.totalorder %s1785_s20, %s1781_s19 }
   0x9   : > { %p123_p1 = scmp.eq.s32.totalorder %s122_s26, 0  ;;  %p136_p2 = scmp.eq.s32.totalorder %s1851_s22, 1 }
   0xa   : > { %p141_p3 = scmp.ne.s32.totalorder %s1781_s19, %s1777_s18  ;;  %p142_p4 = scmp.eq.s32.totalorder %s1412_s23, 1 }
   0xb   : > { %s1866_s27 = scalar_select %p123_p1, %s1785_s20, %s125_s25  }
   0xc   : > { %p1868_p5 = por %p136_p2, %p135_p0  ;;  %p1872_p6 = por %p142_p4, %p141_p3 }
   0xd   : > { %p1415_p7 = scmp.ge.s32.totalorder %s1789_s21, 1  ;;  %p211_p8 = scmp.lt.s32.totalorder %s1789_s21, 3 }
   0xf   : > { %p212_p9 = pnand %p1415_p7, %p211_p8 }
  0x10   : > { %p251_p10 = scmp.lt.s32.totalorder (!%p212_p9), %s1851_s22, 1  ;;  %v1791_v0 = vmov (!%p212_p9), 0.0|0.0   ;;  %vm1792_vm0 = vmmov (!%p212_p9), 0   ;;  %v1793_v1 = vmov (!%p212_p9), 0.0   ;;  %s1794_s13 = smov (!%p212_p9), 64   ;;  %v1795_v18 = vmov (!%p212_p9), 0  }
  0x11   : > { %215 = sbr.rel (%p212_p9) target bundleno = 5605 (0x15e5), region = 36  ;;  %1582 = vmatprep.subr.bf16.mxu0 (!%p212_p9), %v1791_v0  ;;  %1502 = vmatprep.mubr.msk.f32.mxu0 (!%p212_p9), %vm1792_vm0, %v1793_v1  ;;  %p274_p11 = scmp.eq.s32.totalorder (!%p212_p9), %s1851_s22, 0  ;;  %vm401_vm3 = vcmask (!%p212_p9), 254976   ;;  %vm279_vm4 = vcmask (!%p212_p9), 261120  }
  0x12   : > { %1588 = vmatprep.subr.bf16.mxu1 (!%p212_p9), %v1791_v0  ;;  %1513 = vmatprep.mubr.msk.f32.mxu1 (!%p212_p9), %vm1792_vm0, %v1793_v1  ;;  %s2225_s1 = sld [smem:[#allocation6_spill]] (!%p212_p9)  ;;  %s2226_s0 = sld [smem:[#allocation5_spill]] (!%p212_p9) }
  0x13   : > { %1677 = vset.pattern.permute.xlu1 (!%p212_p9), %v1795_v18  ;;  %1678 = vset.pattern.permute.xlu0 (!%p212_p9), %v1795_v18  ;;  %s2219_s8 = smov (!%p212_p9), 96  }
  0x18   : > { %s1883_s30 = scalar_select %p251_p10, %s1851_s22, 1  ;;  %v1940_v19 = vld [vmem:[%s2226_s0] sm:$0x3] }
  0x19   : > { %s1923_s14 = scalar_select %p274_p11, 0, 7 }
  0x1a   : > { %s1452_s6 = sshll.u32 %s1883_s30, 5  ;;  %s263_s9 = scalar_lea.vmem %s2211_s3, %s1883_s30 }
  0x1b   : > { %s260_s12 = scalar_lea.vmem %s2210_s2, %s1452_s6  ;;  %v1424_v2 = vld [vmem:[%s263_s9] ss:$0 sm:$0xff]  ;;  %s1451_s15 = sshll.u32 %s1883_s30, 4  ;;  %v388_v20 = vstv %s1923_s14 }
  0x1c   : > { %v269_v3 = vld [vmem:[%s260_s12] sm:$0xff]  ;;  %v270_v4 = vld [vmem:[%s260_s12 + $0x8] sm:$0xff]  ;;  %v271_v5 = vld [vmem:[%s260_s12 + $0x10] sm:$0xff]  ;;  %365 = vrot.lane.b32.xlu0 %v1424_v2, %s1794_s13  ;;  %s1929_s23 = scalar_lea.vmem %s2225_s1, %s1451_s15  ;;  %s1422_s25 = sshll.u32 %s1923_s14, 1  ;;  %vm389_vm1 = vcmp.gt.s32.totalorder %v1940_v19, %v388_v20 }
  0x1d   : > { %v1897_v6 = vpack.c.bf16 %v270_v4, %v269_v3  ;;  %v272_v7 = vld [vmem:[%s260_s12 + $0x18] sm:$0xff]  ;;  %s277_s26 = scalar_lea.vmem %s1929_s23, %s1422_s25  ;;  %v390_v24 = vsel %vm389_vm1, 1, %v1795_v18  ;;  %s2214_s9 = sand.u32 1, %s1781_s19  }
  0x1e   : > { %v1900_v8 = vpack.c.bf16 %v272_v7, %v271_v5  ;;  %v278_v13 = vld [vmem:[%s277_s26] sm:$0x3]  ;;  %s1416_s10 = sshll.u32 %s2214_s9, 4  ;;  %s1797_s0 = smov [#allocation2]  }
  0x1f   : > { %1584 = vmatpush3.bf16.msra.mxu0 %v1897_v6  ;;  %1590 = vmatpush3.bf16.msra.mxu1 %v1897_v6  ;;  %s1951_s11 = scalar_lea.vmem [#allocation2], %s1416_s10 }
  0x20   : > { %1585 = vmatprep.subr.bf16.mxu0 %v1791_v0  ;;  %1591 = vmatprep.subr.bf16.mxu1 %v1791_v0  ;;  %s400_s12 = scalar_lea.vmem %s1951_s11, %s1422_s25 [#allocation2] }
  0x21   : > { %s1968_s14 = scalar_select %p274_p11, 1, 6 }
  0x22   : > { %s1991_s17 = scalar_select %p274_p11, 2, 5 }
  0x23   : > { %1587 = vmatpush3.bf16.msra.mxu0 %v1900_v8  ;;  %1593 = vmatpush3.bf16.msra.mxu1 %v1900_v8  ;;  %s1425_s15 = sshll.u32 %s1968_s14, 1  ;;  %v506_v44 = vstv %s1968_s14 }
  0x24   : > { %1594 = vmatprep.subr.bf16.mxu0 %v1791_v0  ;;  %1600 = vmatprep.subr.bf16.mxu1 %v1791_v0  ;;  %s405_s16 = scalar_lea.vmem %s1929_s23, %s1425_s15  ;;  %vm507_vm5 = vcmp.gt.s32.totalorder %v1940_v19, %v506_v44  ;;  %v627_v61 = vstv %s1991_s17  ;;  %s2218_s25 = sshll.u32 %s1991_s17, 1 }
  0x25   : > { %v406_v39 = vld [vmem:[%s405_s16] sm:$0x3]  ;;  %v508_v45 = vsel %vm507_vm5, 1, %v1795_v18  ;;  %vm628_vm7 = vcmp.gt.s32.totalorder %v1940_v19, %v627_v61  ;;  %s523_s26 = scalar_lea.vmem %s1929_s23, %s2218_s25 }
  0x26   : > { %1503 = vmatmul.mubr.f32.vlgmr.msra.gmra.mrb[0].mxu0 %v1793_v1  ;;  %v629_v3 = vsel %vm628_vm7, 1, %v1795_v18  ;;  %v524_v4 = vld [vmem:[%s523_s26] sm:$0x3]  ;;  %s2016_s6 = scalar_select %p274_p11, 3, 4 }
  0x27   : > { %1596 = vmatpush3.bf16.msra.mxu0 %v1897_v6  ;;  %1524 = vmatprep.mubr.msk.f32.mxu0 %vm1792_vm0, %v1793_v1 }
  0x28   : > { %1597 = vmatprep.subr.bf16.mxu0 %v1791_v0  ;;  %s1431_s7 = sshll.u32 %s2016_s6, 1 }
  0x29   : > { %s644_s10 = scalar_lea.vmem %s1929_s23, %s1431_s7 }
  0x2b   : > { %1599 = vmatpush3.bf16.msra.mxu0 %v1900_v8 }
  0x2c   : > { %1606 = vmatprep.subr.bf16.mxu0 %v1791_v0 }
  0x8e   : > { %v1916_v9 = vpop.permute.xlu0 %365 }
  0xf9   : > { %v349_v10 = vpop.f32.mrb[0].mxu0 }
  0xfa   : > { %v368_v11 = vadd.f32 %v1916_v9, %v349_v10  ;;  %v1504_v12 = vpop.f32.mrb[1].mxu0  ;;  %v353_v14 = vadd.f32 %v349_v10, %v278_v13 }
  0xfc   : > { %370 = vrot.lane.b32.xlu0 %v368_v11, %s1794_s13  ;;  %v1423_v15 = vmul.f32 -1.442695, %v353_v14 }
  0xfe   : > { %1679 = vpow2.f32 %v1423_v15 }
 0x108   : > { %v1680_v16 = vpop.eup %1679 }
 0x109   : > { %v357_v17 = vadd.f32 1.0, %v1680_v16 }
 0x10b   : > { %1681 = vrcp.f32 %v357_v17 }
 0x115   : > { %v1682_v21 = vpop.eup %1681 }
 0x116   : > { %v380_v28 = vsub.f32 1.0, %v1682_v21  ;;  %v386_v31 = vmul.f32 0.0, %v1682_v21 }
 0x16e   : > { %v371_v22 = vpop.permute.xlu0 %370 }
 0x16f   : > { %v373_v23 = vmul.f32 %v1682_v21, %v371_v22 }
 0x171   : > { %375 = vrot.lane.b32.xlu1 %v373_v23, %s1794_s13 }
 0x175   : > { %392 = vperm.xlu1 %1677, %v390_v24  }
 0x1e3   : > { %v376_v25 = vpop.permute.xlu1 %375 }
 0x1e4   : > { %v378_v26 = vadd.f32 %v376_v25, %v278_v13 }
 0x1e6   : > { %1683 = vtanh.f32 %v378_v26 }
 0x1f0   : > { %v1684_v27 = vpop.eup %1683 }
 0x1f1   : > { %382 = vrot.lane.b32.xlu0 %v1684_v27, %s2219_s8 }
 0x1f4   : > { %v393_v29 = vpop.permute.xlu1 %392 }
 0x1f5   : > { %vm394_vm2 = vcmp.eq.s32.totalorder %v393_v29, 1  ;;  %v748_v29 = vstv %s2016_s6 }
 0x1f6   : > { %vm749_vm9 = vcmp.gt.s32.totalorder %v1940_v19, %v748_v29 }
 0x263   : > { %v383_v30 = vpop.permute.xlu0 %382 }
 0x264   : > { %v385_v32 = vmul.f32 %v383_v30, %v380_v28 }
 0x266   : > { %v387_v33 = vadd.f32 %v386_v31, %v385_v32 }
 0x268   : > { %v395_v34 = vsel %vm394_vm2, %v387_v33, 0.0  ;;  %v750_v33 = vsel %vm749_vm9, 1, %v1795_v18 }
 0x269   : > { %397 = vrot.lane.b32.xlu1 %v395_v34, %s2219_s8 }
 0x2db   : > { %v398_v35 = vpop.permute.xlu1 %397 }
 0x2dc   : > { %402 = vst.msk [vmem:[%s400_s12] sm:$0x3] %vm401_vm3, %v398_v35  ;;  %1514 = vmatmul.mubr.msk.f32.vlgmr.msra.gmra.mrb[0].mxu1 %vm279_vm4, %v398_v35  ;;  %s2040_s12 = scalar_select %p274_p11, 4, 3 }
 0x2dd   : > { %1602 = vmatpush3.bf16.msra.mxu1 %v1897_v6  ;;  %1535 = vmatprep.mubr.msk.f32.mxu1 %vm1792_vm0, %v1793_v1 }
 0x2de   : > { %1603 = vmatprep.subr.bf16.mxu1 %v1791_v0  ;;  %s2215_s16 = sshll.u32 %s2040_s12, 1  ;;  %s2230_s6 = sshll.u32 %s2040_s12, 1 }
 0x2df   : > { %s765_s26 = scalar_lea.vmem %s1929_s23, %s2215_s16 }
 0x2e1   : > { %1605 = vmatpush3.bf16.msra.mxu1 %v1900_v8 }
 0x2e2   : > { %1612 = vmatprep.subr.bf16.mxu1 %v1791_v0 }
 0x3af   : > { %v475_v36 = vpop.f32.mrb[0].mxu1 }
 0x3b0   : > { %v486_v37 = vadd.f32 %v475_v36, %v1916_v9  ;;  %v1515_v38 = vpop.f32.mrb[1].mxu1  ;;  %v479_v40 = vadd.f32 %v475_v36, %v406_v39 }
 0x3b2   : > { %488 = vrot.lane.b32.xlu0 %v486_v37, %s1794_s13  ;;  %v1427_v41 = vmul.f32 -1.442695, %v479_v40 }
 0x3b4   : > { %1685 = vpow2.f32 %v1427_v41 }
 0x3b6   : > { %510 = vperm.xlu0 %1678, %v508_v45  }
 0x3be   : > { %v1686_v42 = vpop.eup %1685 }
 0x3bf   : > { %v483_v43 = vadd.f32 1.0, %v1686_v42 }
 0x3c1   : > { %1687 = vrcp.f32 %v483_v43 }
 0x3cb   : > { %v1688_v46 = vpop.eup %1687 }
 0x3cc   : > { %v498_v52 = vsub.f32 1.0, %v1688_v46  ;;  %v504_v55 = vmul.f32 %v1688_v46, %v395_v34 }
 0x424   : > { %v489_v47 = vpop.permute.xlu0 %488 }
 0x425   : > { %v491_v48 = vmul.f32 %v1688_v46, %v489_v47 }
 0x427   : > { %493 = vrot.lane.b32.xlu1 %v491_v48, %s1794_s13 }
 0x435   : > { %v511_v53 = vpop.permute.xlu0 %510 }
 0x436   : > { %vm512_vm6 = vcmp.eq.s32.totalorder %v511_v53, 1 }
 0x499   : > { %v494_v49 = vpop.permute.xlu1 %493 }
 0x49a   : > { %v496_v50 = vadd.f32 %v494_v49, %v406_v39 }
 0x49c   : > { %1689 = vtanh.f32 %v496_v50 }
 0x4a6   : > { %v1690_v51 = vpop.eup %1689 }
 0x4a7   : > { %500 = vrot.lane.b32.xlu1 %v1690_v51, %s2219_s8 }
 0x519   : > { %v501_v54 = vpop.permute.xlu1 %500 }
 0x51a   : > { %v503_v56 = vmul.f32 %v501_v54, %v498_v52  ;;  %v869_v54 = vstv %s2040_s12 }
 0x51b   : > { %vm870_vm11 = vcmp.gt.s32.totalorder %v1940_v19, %v869_v54 }
 0x51c   : > { %v505_v57 = vadd.f32 %v504_v55, %v503_v56 }
 0x51e   : > { %v1979_v58 = vsel %vm512_vm6, %v505_v57, 0.0  ;;  %v513_v59 = vsel %vm512_vm6, %v505_v57, %v395_v34  ;;  %v645_v34 = vld [vmem:[%s644_s10] sm:$0x3]  ;;  %s2064_s10 = scalar_select %p274_p11, 5, 2 }
 0x51f   : > { %526 = vrot.lane.b32.xlu1 %v513_v59, %s2219_s8 }
 0x591   : > { %v527_v60 = vpop.permute.xlu1 %526 }
 0x592   : > { %1525 = vmatmul.mubr.msk.f32.vlgmr.msra.gmra.mrb[2].mxu0 %vm279_vm4, %v527_v60  ;;  %v766_v60 = vld [vmem:[%s765_s26] sm:$0x3]  ;;  %s2216_s26 = sshll.u32 %s2064_s10, 1 }
 0x593   : > { %1608 = vmatpush3.bf16.msra.mxu0 %v1897_v6  ;;  %1546 = vmatprep.mubr.msk.f32.mxu0 %vm1792_vm0, %v1793_v1  ;;  %s886_s9 = scalar_lea.vmem %s1929_s23, %s2216_s26 }
 0x594   : > { %1609 = vmatprep.subr.bf16.mxu0 %v1791_v0 }
 0x597   : > { %1611 = vmatpush3.bf16.msra.mxu0 %v1900_v8 }
 0x598   : > { %1618 = vmatprep.subr.bf16.mxu0 %v1791_v0 }
 0x665   : > { %v596_v62 = vpop.f32.mrb[2].mxu0 }
 0x666   : > { %v607_v63 = vadd.f32 %v596_v62, %v1916_v9  ;;  %v1526_v2 = vpop.f32.mrb[3].mxu0  ;;  %v600_v5 = vadd.f32 %v596_v62, %v524_v4 }
 0x668   : > { %609 = vrot.lane.b32.xlu0 %v607_v63, %s1794_s13  ;;  %v1430_v7 = vmul.f32 -1.442695, %v600_v5 }
 0x66a   : > { %1691 = vpow2.f32 %v1430_v7 }
 0x66c   : > { %631 = vperm.xlu0 %1678, %v629_v3  }
 0x674   : > { %v1692_v10 = vpop.eup %1691 }
 0x675   : > { %v604_v11 = vadd.f32 1.0, %v1692_v10 }
 0x677   : > { %1693 = vrcp.f32 %v604_v11 }
 0x681   : > { %v1694_v12 = vpop.eup %1693 }
 0x682   : > { %v619_v20 = vsub.f32 1.0, %v1694_v12  ;;  %v625_v23 = vmul.f32 %v1694_v12, %v513_v59 }
 0x6da   : > { %v610_v13 = vpop.permute.xlu0 %609 }
 0x6db   : > { %v612_v14 = vmul.f32 %v1694_v12, %v610_v13 }
 0x6dd   : > { %614 = vrot.lane.b32.xlu1 %v612_v14, %s1794_s13 }
 0x6eb   : > { %v632_v22 = vpop.permute.xlu0 %631 }
 0x6ec   : > { %vm633_vm8 = vcmp.eq.s32.totalorder %v632_v22, 1 }
 0x74f   : > { %v615_v15 = vpop.permute.xlu1 %614 }
 0x750   : > { %v617_v16 = vadd.f32 %v615_v15, %v524_v4 }
 0x752   : > { %1695 = vtanh.f32 %v617_v16 }
 0x75c   : > { %v1696_v17 = vpop.eup %1695 }
 0x75d   : > { %621 = vrot.lane.b32.xlu1 %v1696_v17, %s2219_s8 }
 0x7cf   : > { %v622_v21 = vpop.permute.xlu1 %621 }
 0x7d0   : > { %v624_v24 = vmul.f32 %v622_v21, %v619_v20 }
 0x7d2   : > { %v626_v25 = vadd.f32 %v625_v23, %v624_v24  ;;  %v990_v23 = vstv %s2064_s10 }
 0x7d3   : > { %vm991_vm13 = vcmp.gt.s32.totalorder %v1940_v19, %v990_v23 }
 0x7d4   : > { %v634_v26 = vsel %vm633_vm8, %v626_v25, %v513_v59  ;;  %v2004_v27 = vsel %vm633_vm8, %v626_v25, 0.0  ;;  %v871_v59 = vsel %vm870_vm11, 1, %v1795_v18 }
 0x7d5   : > { %647 = vrot.lane.b32.xlu0 %v634_v26, %s2219_s8 }
 0x847   : > { %v648_v28 = vpop.permute.xlu0 %647 }
 0x848   : > { %1536 = vmatmul.mubr.msk.f32.vlgmr.msra.gmra.mrb[2].mxu1 %vm279_vm4, %v648_v28 }
 0x849   : > { %1614 = vmatpush3.bf16.msra.mxu1 %v1897_v6  ;;  %1557 = vmatprep.mubr.msk.f32.mxu1 %vm1792_vm0, %v1793_v1 }
 0x84a   : > { %1615 = vmatprep.subr.bf16.mxu1 %v1791_v0 }
 0x84d   : > { %1617 = vmatpush3.bf16.msra.mxu1 %v1900_v8 }
 0x84e   : > { %1624 = vmatprep.subr.bf16.mxu1 %v1791_v0 }
 0x91b   : > { %v717_v30 = vpop.f32.mrb[2].mxu1 }
 0x91c   : > { %v728_v31 = vadd.f32 %v717_v30, %v1916_v9  ;;  %v1537_v32 = vpop.f32.mrb[3].mxu1  ;;  %v721_v35 = vadd.f32 %v717_v30, %v645_v34 }
 0x91e   : > { %730 = vrot.lane.b32.xlu1 %v728_v31, %s1794_s13  ;;  %v1433_v36 = vmul.f32 -1.442695, %v721_v35 }
 0x920   : > { %1697 = vpow2.f32 %v1433_v36 }
 0x922   : > { %752 = vperm.xlu1 %1677, %v750_v33  }
 0x92a   : > { %v1698_v37 = vpop.eup %1697 }
 0x92b   : > { %v725_v38 = vadd.f32 1.0, %v1698_v37 }
 0x92d   : > { %1699 = vrcp.f32 %v725_v38 }
 0x937   : > { %v1700_v39 = vpop.eup %1699 }
 0x938   : > { %v740_v45 = vsub.f32 1.0, %v1700_v39  ;;  %v746_v48 = vmul.f32 %v1700_v39, %v634_v26 }
 0x990   : > { %v731_v40 = vpop.permute.xlu1 %730 }
 0x991   : > { %v733_v41 = vmul.f32 %v1700_v39, %v731_v40 }
 0x993   : > { %735 = vrot.lane.b32.xlu0 %v733_v41, %s1794_s13 }
 0x9a1   : > { %v753_v47 = vpop.permute.xlu1 %752 }
 0x9a2   : > { %vm754_vm10 = vcmp.eq.s32.totalorder %v753_v47, 1 }
 0xa05   : > { %v736_v42 = vpop.permute.xlu0 %735 }
 0xa06   : > { %v738_v43 = vadd.f32 %v736_v42, %v645_v34 }
 0xa08   : > { %1701 = vtanh.f32 %v738_v43 }
 0xa12   : > { %v1702_v44 = vpop.eup %1701 }
 0xa13   : > { %742 = vrot.lane.b32.xlu0 %v1702_v44, %s2219_s8 }
 0xa85   : > { %v743_v46 = vpop.permute.xlu0 %742 }
 0xa86   : > { %v745_v49 = vmul.f32 %v743_v46, %v740_v45 }
 0xa88   : > { %v747_v50 = vadd.f32 %v746_v48, %v745_v49 }
 0xa8a   : > { %v755_v51 = vsel %vm754_vm10, %v747_v50, %v634_v26  ;;  %v2029_v52 = vsel %vm754_vm10, %v747_v50, 0.0 }
 0xa8b   : > { %768 = vrot.lane.b32.xlu1 %v755_v51, %s2219_s8 }
 0xafd   : > { %v769_v53 = vpop.permute.xlu1 %768 }
 0xafe   : > { %1547 = vmatmul.mubr.msk.f32.vlgmr.msra.gmra.mrb[4].mxu0 %vm279_vm4, %v769_v53 }
 0xaff   : > { %1620 = vmatpush3.bf16.msra.mxu0 %v1897_v6  ;;  %1568 = vmatprep.mubr.msk.f32.mxu0 %vm1792_vm0, %v1793_v1 }
 0xb00   : > { %1621 = vmatprep.subr.bf16.mxu0 %v1791_v0 }
 0xb03   : > { %1623 = vmatpush3.bf16.msra.mxu0 %v1900_v8 }
 0xbd1   : > { %v838_v55 = vpop.f32.mrb[4].mxu0 }
 0xbd2   : > { %v849_v56 = vadd.f32 %v838_v55, %v1916_v9  ;;  %v1548_v57 = vpop.f32.mrb[5].mxu0  ;;  %v842_v61 = vadd.f32 %v838_v55, %v766_v60 }
 0xbd4   : > { %851 = vrot.lane.b32.xlu0 %v849_v56, %s1794_s13  ;;  %v1436_v62 = vmul.f32 -1.442695, %v842_v61 }
 0xbd6   : > { %1703 = vpow2.f32 %v1436_v62 }
 0xbd8   : > { %873 = vperm.xlu0 %1678, %v871_v59  }
 0xbe0   : > { %v1704_v63 = vpop.eup %1703 }
 0xbe1   : > { %v846_v2 = vadd.f32 1.0, %v1704_v63 }
 0xbe3   : > { %1705 = vrcp.f32 %v846_v2 }
 0xbed   : > { %v1706_v3 = vpop.eup %1705 }
 0xbee   : > { %v861_v12 = vsub.f32 1.0, %v1706_v3  ;;  %v867_v15 = vmul.f32 %v1706_v3, %v755_v51 }
 0xc46   : > { %v852_v4 = vpop.permute.xlu0 %851 }
 0xc47   : > { %v854_v5 = vmul.f32 %v1706_v3, %v852_v4 }
 0xc49   : > { %856 = vrot.lane.b32.xlu1 %v854_v5, %s1794_s13 }
 0xc57   : > { %v874_v14 = vpop.permute.xlu0 %873 }
 0xc58   : > { %vm875_vm12 = vcmp.eq.s32.totalorder %v874_v14, 1 }
 0xcbb   : > { %v857_v7 = vpop.permute.xlu1 %856 }
 0xcbc   : > { %v859_v10 = vadd.f32 %v857_v7, %v766_v60 }
 0xcbe   : > { %1707 = vtanh.f32 %v859_v10 }
 0xcc8   : > { %v1708_v11 = vpop.eup %1707 }
 0xcc9   : > { %863 = vrot.lane.b32.xlu1 %v1708_v11, %s2219_s8 }
 0xd3b   : > { %v864_v13 = vpop.permute.xlu1 %863 }
 0xd3c   : > { %v866_v16 = vmul.f32 %v864_v13, %v861_v12 }
 0xd3e   : > { %v868_v17 = vadd.f32 %v867_v15, %v866_v16 }
 0xd40   : > { %v876_v20 = vsel %vm875_vm12, %v868_v17, %v755_v51  ;;  %v2053_v21 = vsel %vm875_vm12, %v868_v17, 0.0 }
 0xd41   : > { %889 = vrot.lane.b32.xlu0 %v876_v20, %s2219_s8 }
 0xdb3   : > { %v890_v22 = vpop.permute.xlu0 %889 }
 0xdb4   : > { %1558 = vmatmul.mubr.msk.f32.vlgmr.msra.gmra.mrb[4].mxu1 %vm279_vm4, %v890_v22 }
 0xdb5   : > { %1626 = vmatpush3.bf16.msra.mxu1 %v1897_v6  ;;  %1579 = vmatprep.mubr.msk.f32.mxu1 %vm1792_vm0, %v1793_v1  ;;  %v992_v1 = vsel %vm991_vm13, 1, %v1795_v18 }
 0xdb6   : > { %1627 = vmatprep.subr.bf16.mxu1 %v1791_v0  ;;  %v887_v0 = vld [vmem:[%s886_s9] sm:$0x3]  ;;  %s2081_s9 = scalar_select %p274_p11, 6, 1 }
 0xdb8   : > { %v1111_v45 = vstv %s2081_s9  ;;  %s2217_s16 = sshll.u32 %s2081_s9, 1 }
 0xdb9   : > { %1629 = vmatpush3.bf16.msra.mxu1 %v1900_v8  ;;  %vm1112_vm15 = vcmp.gt.s32.totalorder %v1940_v19, %v1111_v45  ;;  %s1007_s26 = scalar_lea.vmem %s1929_s23, %s2217_s16 }
 0xdba   : > { %v1113_v49 = vsel %vm1112_vm15, 1, %v1795_v18  ;;  %v1008_v50 = vld [vmem:[%s1007_s26] sm:$0x3]  ;;  %s2098_s26 = scalar_select %p274_p11, 7, 0 }
 0xdbc   : > { %v1232_v13 = vstv %s2098_s26  ;;  %s1443_s16 = sshll.u32 %s2098_s26, 1 }
 0xdbd   : > { %vm1233_vm1 = vcmp.gt.s32.totalorder %v1940_v19, %v1232_v13  ;;  %s1128_s25 = scalar_lea.vmem %s1929_s23, %s1443_s16  ;;  %s761_s23 = scalar_lea.vmem %s1951_s11, %s1431_s7 [#allocation2] }
 0xdbe   : > { %v1234_v17 = vsel %vm1233_vm1, 1, %v1795_v18  ;;  %s2231_s7 = sshll.u32 %s2081_s9, 1  ;;  %s1245_s12 = scalar_lea.vmem %s1951_s11, %s1443_s16 [#allocation2] }
 0xdbf   : > { %s1731_s16 = sshll.u32 %s1797_s0, 4  ;;  %s1732_s16 = int_to_ptr.vmem [resolvable:$false] %s1731_s16 }
 0xdc0   : > { %s1733_s9 = scalar_lea.vmem %s1732_s16, 512 }
 0xe87   : > { %v959_v24 = vpop.f32.mrb[4].mxu1 }
 0xe88   : > { %v970_v25 = vadd.f32 %v959_v24, %v1916_v9  ;;  %v1559_v26 = vpop.f32.mrb[5].mxu1  ;;  %v963_v6 = vadd.f32 %v959_v24, %v887_v0 }
 0xe8a   : > { %972 = vrot.lane.b32.xlu1 %v970_v25, %s1794_s13  ;;  %v1439_v8 = vmul.f32 -1.442695, %v963_v6 }
 0xe8c   : > { %1709 = vpow2.f32 %v1439_v8 }
 0xe8e   : > { %994 = vperm.xlu1 %1677, %v992_v1  }
 0xe96   : > { %v1710_v28 = vpop.eup %1709 }
 0xe97   : > { %v967_v29 = vadd.f32 1.0, %v1710_v28 }
 0xe99   : > { %1711 = vrcp.f32 %v967_v29 }
 0xea3   : > { %v1712_v30 = vpop.eup %1711 }
 0xea4   : > { %v982_v36 = vsub.f32 1.0, %v1712_v30  ;;  %v988_v39 = vmul.f32 %v1712_v30, %v876_v20 }
 0xefc   : > { %v973_v31 = vpop.permute.xlu1 %972 }
 0xefd   : > { %v975_v32 = vmul.f32 %v1712_v30, %v973_v31 }
 0xeff   : > { %977 = vrot.lane.b32.xlu0 %v975_v32, %s1794_s13 }
 0xf0d   : > { %v995_v38 = vpop.permute.xlu1 %994 }
 0xf0e   : > { %vm996_vm14 = vcmp.eq.s32.totalorder %v995_v38, 1 }
 0xf71   : > { %v978_v33 = vpop.permute.xlu0 %977 }
 0xf72   : > { %v980_v34 = vadd.f32 %v978_v33, %v887_v0 }
 0xf74   : > { %1713 = vtanh.f32 %v980_v34 }
 0xf7e   : > { %v1714_v35 = vpop.eup %1713 }
 0xf7f   : > { %984 = vrot.lane.b32.xlu0 %v1714_v35, %s2219_s8 }
 0xff1   : > { %v985_v37 = vpop.permute.xlu0 %984 }
 0xff2   : > { %v987_v40 = vmul.f32 %v985_v37, %v982_v36 }
 0xff4   : > { %v989_v41 = vadd.f32 %v988_v39, %v987_v40 }
 0xff6   : > { %v997_v42 = vsel %vm996_vm14, %v989_v41, %v876_v20  ;;  %v998_v43 = vsel %vm996_vm14, %v989_v41, 0.0 }
 0xff7   : > { %1010 = vrot.lane.b32.xlu1 %v997_v42, %s2219_s8 }
0x1069   : > { %v1011_v44 = vpop.permute.xlu1 %1010 }
0x106a   : > { %1569 = vmatmul.mubr.msk.f32.vlgmr.msra.gmra.mrb[6].mxu0 %vm279_vm4, %v1011_v44 }
0x113d   : > { %v1080_v46 = vpop.f32.mrb[6].mxu0 }
0x113e   : > { %v1091_v47 = vadd.f32 %v1080_v46, %v1916_v9  ;;  %v1570_v48 = vpop.f32.mrb[7].mxu0  ;;  %v1084_v51 = vadd.f32 %v1080_v46, %v1008_v50 }
0x1140   : > { %1093 = vrot.lane.b32.xlu0 %v1091_v47, %s1794_s13  ;;  %v1442_v53 = vmul.f32 -1.442695, %v1084_v51 }
0x1142   : > { %1715 = vpow2.f32 %v1442_v53 }
0x1144   : > { %1115 = vperm.xlu0 %1678, %v1113_v49  }
0x114c   : > { %v1716_v54 = vpop.eup %1715 }
0x114d   : > { %v1088_v55 = vadd.f32 1.0, %v1716_v54 }
0x114f   : > { %1717 = vrcp.f32 %v1088_v55 }
0x1159   : > { %v1718_v56 = vpop.eup %1717 }
0x115a   : > { %v1103_v63 = vsub.f32 1.0, %v1718_v56  ;;  %v1109_v4 = vmul.f32 %v1718_v56, %v997_v42 }
0x11b2   : > { %v1094_v57 = vpop.permute.xlu0 %1093 }
0x11b3   : > { %v1096_v59 = vmul.f32 %v1718_v56, %v1094_v57 }
0x11b5   : > { %1098 = vrot.lane.b32.xlu1 %v1096_v59, %s1794_s13 }
0x11c3   : > { %v1116_v3 = vpop.permute.xlu0 %1115 }
0x11c4   : > { %vm1117_vm0 = vcmp.eq.s32.totalorder %v1116_v3, 1 }
0x1227   : > { %v1099_v60 = vpop.permute.xlu1 %1098 }
0x1228   : > { %v1101_v61 = vadd.f32 %v1099_v60, %v1008_v50 }
0x122a   : > { %1719 = vtanh.f32 %v1101_v61 }
0x1234   : > { %v1720_v62 = vpop.eup %1719 }
0x1235   : > { %1105 = vrot.lane.b32.xlu1 %v1720_v62, %s2219_s8 }
0x12a7   : > { %v1106_v2 = vpop.permute.xlu1 %1105 }
0x12a8   : > { %v1108_v5 = vmul.f32 %v1106_v2, %v1103_v63 }
0x12aa   : > { %v1110_v7 = vadd.f32 %v1109_v4, %v1108_v5 }
0x12ac   : > { %v1118_v10 = vsel %vm1117_vm0, %v1110_v7, %v997_v42  ;;  %v1119_v11 = vsel %vm1117_vm0, %v1110_v7, 0.0 }
0x12ad   : > { %1131 = vrot.lane.b32.xlu0 %v1118_v10, %s2219_s8 }
0x131f   : > { %v1132_v12 = vpop.permute.xlu0 %1131 }
0x1320   : > { %1580 = vmatmul.mubr.msk.f32.vlgmr.msra.gmra.mrb[6].mxu1 %vm279_vm4, %v1132_v12 }
0x13f3   : > { %v1201_v14 = vpop.f32.mrb[6].mxu1 }
0x13f4   : > { %v1212_v15 = vadd.f32 %v1201_v14, %v1916_v9  ;;  %v1581_v16 = vpop.f32.mrb[7].mxu1  ;;  %v1129_v9 = vld [vmem:[%s1128_s25] sm:$0x3] }
0x13f5   : > { %v1205_v19 = vadd.f32 %v1201_v14, %v1129_v9 }
0x13f6   : > { %1214 = vrot.lane.b32.xlu1 %v1212_v15, %s1794_s13 }
0x13f7   : > { %v1445_v20 = vmul.f32 -1.442695, %v1205_v19 }
0x13f9   : > { %1721 = vpow2.f32 %v1445_v20 }
0x13fa   : > { %1236 = vperm.xlu1 %1677, %v1234_v17  }
0x13fe   : > { %516 = vrot.lane.b32.xlu1 %v1979_v58, %s2219_s8 }
0x1402   : > { %758 = vrot.lane.b32.xlu1 %v2029_v52, %s2219_s8 }
0x1403   : > { %v1722_v18 = vpop.eup %1721 }
0x1404   : > { %v1209_v22 = vadd.f32 1.0, %v1722_v18 }
0x1406   : > { %1000 = vrot.lane.b32.xlu1 %v998_v43, %s2219_s8  ;;  %1723 = vrcp.f32 %v1209_v22  ;;  %s519_s8 = scalar_lea.vmem %s1951_s11, %s1425_s15 [#allocation2]  ;;  %s2229_s15 = sshll.u32 %s2064_s10, 1 }
0x1407   : > { %s1003_s25 = scalar_lea.vmem %s1951_s11, %s2229_s15 [#allocation2]  ;;  %s1124_s10 = scalar_lea.vmem %s1951_s11, %s2231_s7 [#allocation2] }
0x1410   : > { %v1724_v58 = vpop.eup %1723 }
0x1411   : > { %v1224_v8 = vsub.f32 1.0, %v1724_v58  ;;  %v1230_v29 = vmul.f32 %v1724_v58, %v1118_v10 }
0x1468   : > { %v1215_v23 = vpop.permute.xlu1 %1214 }
0x1469   : > { %v1217_v24 = vmul.f32 %v1724_v58, %v1215_v23 }
0x146b   : > { %1219 = vrot.lane.b32.xlu0 %v1217_v24, %s1794_s13  ;;  %s2227_s13 = smov 96  }
0x1479   : > { %v1237_v52 = vpop.permute.xlu1 %1236 }
0x147a   : > { %vm1238_vm2 = vcmp.eq.s32.totalorder %v1237_v52, 1 }
0x147d   : > { %v517_v25 = vpop.permute.xlu1 %516 }
0x147e   : > { %520 = vst.msk [vmem:[%s519_s8] sm:$0x3] %vm401_vm3, %v517_v25  ;;  %s2228_s8 = sshll.u32 %s1991_s17, 1  ;;  %s882_s17 = scalar_lea.vmem %s1951_s11, %s2230_s6 [#allocation2] }
0x147f   : > { %s640_s14 = scalar_lea.vmem %s1951_s11, %s2228_s8 [#allocation2]  ;;  %s1453_s8 = sshll.u32 %s1851_s22, 8 }
0x1480   : > { %s2159_s1 = scalar_lea.hbm %s2212_s4, %s1453_s8  ;;  %s2232_s22 = sand.u32 1, %s1781_s19  }
0x1481   : > { %v759_v26 = vpop.permute.xlu1 %758 }
0x1482   : > { %762 = vst.msk [vmem:[%s761_s23] sm:$0x3] %vm401_vm3, %v759_v26  ;;  %s1421_s23 = sshll.u32 %s1883_s30, 1  ;;  %s2167_s30 = scalar_lea.sflag [#allocation3], %s2232_s22 }
0x1483   : > { %s267_s6 = scalar_lea.vmem %s2213_s5, %s1421_s23 }
0x14dd   : > { %v1220_v1 = vpop.permute.xlu0 %1219 }
0x14de   : > { %v1222_v0 = vadd.f32 %v1220_v1, %v1129_v9 }
0x14e0   : > { %1725 = vtanh.f32 %v1222_v0 }
0x14ea   : > { %v1726_v6 = vpop.eup %1725 }
0x14eb   : > { %1226 = vrot.lane.b32.xlu0 %v1726_v6, %s2227_s13 }
0x14ef   : > { %637 = vrot.lane.b32.xlu0 %v2004_v27, %s2227_s13 }
0x14f3   : > { %879 = vrot.lane.b32.xlu0 %v2053_v21, %s2227_s13  ;;  %v1001_v21 = vpop.permute.xlu1 %1000 }
0x14f7   : > { %1121 = vrot.lane.b32.xlu0 %v1119_v11, %s2227_s13 }
0x155d   : > { %v1227_v28 = vpop.permute.xlu0 %1226 }
0x155e   : > { %v1229_v30 = vmul.f32 %v1227_v28, %v1224_v8 }
0x1560   : > { %v1231_v31 = vadd.f32 %v1230_v29, %v1229_v30 }
0x1561   : > { %v638_v27 = vpop.permute.xlu0 %637 }
0x1562   : > { %641 = vst.msk [vmem:[%s640_s14] sm:$0x3] %vm401_vm3, %v638_v27  ;;  %v1240_v32 = vsel %vm1238_vm2, %v1231_v31, 0.0  ;;  %v1239_v33 = vsel %vm1238_vm2, %v1231_v31, %v1118_v10  ;;  %s1270_s14 = sshll.u32 %s1951_s11, 4  ;;  %s2161_s14 = int_to_ptr.vmem [resolvable:$true] %s1270_s14 }
0x1563   : > { %1004 = vst.msk [vmem:[%s1003_s25] sm:$0x3] %vm401_vm3, %v1001_v21  ;;  %1242 = vrot.lane.b32.xlu1 %v1240_v32, %s2227_s13  ;;  %1248 = vrot.lane.b32.xlu0 %v1239_v33, %s2227_s13  ;;  %s1727_s11 = scalar_lea.vmem %s2161_s14, 256  ;;  %p1734_p1 = scmp.lt.s32.totalorder %s2161_s14, %s1732_s16 }
0x1564   : > { %p1728_p12 = scmp.ne.s32.totalorder %s2161_s14, %s1727_s11  ;;  %p1735_p2 = scmp.lt.s32.totalorder %s1733_s9, %s1727_s11 }
0x1565   : > { %v880_v34 = vpop.permute.xlu0 %879 }
0x1566   : > { %883 = vst.msk [vmem:[%s882_s17] sm:$0x3] %vm401_vm3, %v880_v34  ;;  %p1729_p13 = pnand %p1728_p12, %p1868_p5  ;;  %p1736_p3 = por %p1735_p2, %p1734_p1 }
0x1568   : > { %p1730_p0 = pneg %p1729_p13 }
0x1569   : > { %v1122_v35 = vpop.permute.xlu0 %1121 }
0x156a   : > { %1125 = vst.msk [vmem:[%s1124_s10] sm:$0x3] %vm401_vm3, %v1122_v35  ;;  %p1737_p4 = pnand %p1736_p3, %p1730_p0 }
0x15d5   : > { %v1243_v36 = vpop.permute.xlu1 %1242  ;;  %v1249_v37 = vpop.permute.xlu0 %1248 }
0x15d6   : > { %1246 = vst.msk [vmem:[%s1245_s12] sm:$0x3] %vm401_vm3, %v1243_v36  ;;  %1251 = vst.msk [vmem:[%s267_s6] sm:$0x3] %vm401_vm3, %v1249_v37 }
0x15d7   : > { %1740 = shalt.err (!%p1737_p4)
}
0x15d8   : > { %s1741_s26 = scalar_lea.hbm %s2159_s1, 256  ;;  %s1745_s10 = scalar_lea.hbm %s2212_s4, 512 }
0x15d9   : > { %p1742_p7 = scmp.ne.s32.totalorder %s2159_s1, %s1741_s26  ;;  %p1746_p10 = scmp.lt.u32.totalorder %s2159_s1, %s2212_s4 }
0x15da   : > { %p1747_p11 = scmp.lt.u32.totalorder %s1745_s10, %s1741_s26  ;;  %p1749_p13 = scmp.lt.u32.totalorder %s1741_s26, %s2159_s1 }
0x15db   : > { %p1743_p8 = pnand %p1742_p7, %p1868_p5 }
0x15dc   : > { %p1748_p12 = por %p1747_p11, %p1746_p10 }
0x15dd   : > { %p1744_p9 = pneg %p1743_p8 }
0x15de   : > { %p1750_p0 = por %p1749_p13, %p1748_p12 }
0x15e0   : > { %p1751_p1 = pnand %p1750_p0, %p1744_p9 }
0x15e2   : > { %1754 = shalt.err (!%p1751_p1)
}
0x15e3   : > { %s1798_s12 = smov 32   ;;  %s1799_s15 = smov 2  }
0x15e4   : > { %1630 = dma.vmem_to_hbm [thread:$0]  (%p1868_p5), %s2161_s14, 256, %s2159_s1, %s2167_s30, %s1798_s12, %s1798_s12, %s1799_s15  }
0x15e5 PF: > { %p1636_p2 = scmp.ge.s32.totalorder %s1789_s21, 2  ;;  %s1288_s25 = sand.u32 1, %s1777_s18  }
0x15e6   : > { %s1289_s6 = scalar_lea.sflag [#allocation3], %s1288_s25 }
0x15e7   : > { %p1633_p3 = pnand %p1636_p2, %p1872_p6 }
0x15e9   : > { %1772 = dma.done.wait (!%p1633_p3), %s1289_s6, 256  }
0x15ea   : > { %1774 = vsyncadd (!%p1633_p3), %s1289_s6, 4294967040  ;;  %p16_p4 = scmp.ge.s32.totalorder %s1855_s24, 4   ;;  %s2233_s18 = smov %s1781_s19 }
0x15eb   : > { %s2234_s19 = smov %s1785_s20  ;;  %s2235_s20 = smov %s1866_s27 }
0x15ec   : > { %s2236_s21 = smov %s1855_s24  ;;  %18 = sbr.rel (!%p16_p4) target bundleno = 6 (0x6), region = 105 }
0x15f3   :  { %1301 = vsyncpa [#allocation3], 1 }
0x15f4   :  { %1303 = vsyncpa [#allocation3 + $0x1], 1 }

// kernel: instruction_embedding_forward.2
= control target key start
LH: loop header
LB: loop body
LE: loop exit
PB: predicated region body
PF: predicated region fallthrough
CT: control target
= control target key end

     0   :  { %s1718_s18 = smov 0   ;;  %s2013_s0 = inlined_call_operand.vmem [shape: s32[2,1], index: 0, kind: input, shape index: {}]   ;;  %s2014_s1 = inlined_call_operand.vmem [shape: f32[2,8,2,96], index: 1, kind: input, shape index: {}]   ;;  %s2015_s2 = inlined_call_operand.vmem [shape: f32[2,32,96], index: 2, kind: input, shape index: {}]   ;;  %s2016_s3 = inlined_call_operand.vmem [shape: f32[2,1,32], index: 3, kind: input, shape index: {}]   ;;  %s2017_s4 = inlined_call_operand.vmem [shape: f32[2,8,2,32], index: 4, kind: output, shape index: {0}]   ;;  %s2018_s5 = inlined_call_operand.vmem [shape: f32[2,2,32], index: 5, kind: output, shape index: {1}]  }
   0x1 LB: > { %s1724_s19 = sadd.s32 4294967295, %s1680_s18   ;;  %p1397_p0 = scmp.ge.s32.totalorder %s1680_s18, 1  ;;  %s1680_s18 = sphi %s1718_s18, %s16_s18  }
   0x2   : > { %p208_p1 = scmp.lt.s32.totalorder %s1680_s18, 3 }
   0x4   : > { %p209_p2 = pnand %p1397_p0, %p208_p1 }
   0x5   : > { %p248_p3 = scmp.lt.s32.totalorder (!%p209_p2), %s1724_s19, 1  ;;  %v1682_v0 = vmov (!%p209_p2), 0.0|0.0   ;;  %vm1683_vm0 = vmmov (!%p209_p2), 0   ;;  %v1684_v1 = vmov (!%p209_p2), 0.0   ;;  %s1685_s28 = smov (!%p209_p2), 64   ;;  %v1686_v18 = vmov (!%p209_p2), 0  }
   0x6   : > { %212 = sbr.rel (%p209_p2) target bundleno = 5580 (0x15cc), region = 36  ;;  %1562 = vmatprep.subr.bf16.mxu0 (!%p209_p2), %v1682_v0  ;;  %1482 = vmatprep.mubr.msk.f32.mxu0 (!%p209_p2), %vm1683_vm0, %v1684_v1  ;;  %p276_p4 = scmp.eq.s32.totalorder (!%p209_p2), %s1724_s19, 0  ;;  %v1792_v19 = vld [vmem:[%s2013_s0] sm:$0x3] (!%p209_p2)  ;;  %vm403_vm3 = vcmask (!%p209_p2), 254976   ;;  %vm281_vm4 = vcmask (!%p209_p2), 261120  }
   0x7   : > { %1568 = vmatprep.subr.bf16.mxu1 (!%p209_p2), %v1682_v0  ;;  %1493 = vmatprep.mubr.msk.f32.mxu1 (!%p209_p2), %vm1683_vm0, %v1684_v1  ;;  %s1687_s13 = smov (!%p209_p2), 96  }
   0x8   : > { %1624 = vset.pattern.permute.xlu1 (!%p209_p2), %v1686_v18  ;;  %1625 = vset.pattern.permute.xlu0 (!%p209_p2), %v1686_v18 }
   0xd   : > { %s1733_s20 = scalar_select %p248_p3, %s1724_s19, 1 }
   0xe   : > { %s1773_s29 = scalar_select %p276_p4, 0, 7 }
   0xf   : > { %s1432_s21 = sshll.u32 %s1733_s20, 5  ;;  %s260_s24 = scalar_lea.vmem %s2016_s3, %s1733_s20 }
  0x10   : > { %s257_s27 = scalar_lea.vmem %s2015_s2, %s1432_s21  ;;  %v1407_v2 = vld [vmem:[%s260_s24] ss:$0 sm:$0xff]  ;;  %s1431_s30 = sshll.u32 %s1733_s20, 4  ;;  %v390_v20 = vstv %s1773_s29 }
  0x11   : > { %v271_v3 = vld [vmem:[%s257_s27] sm:$0xff]  ;;  %v272_v4 = vld [vmem:[%s257_s27 + $0x8] sm:$0xff]  ;;  %v273_v5 = vld [vmem:[%s257_s27 + $0x10] sm:$0xff]  ;;  %367 = vrot.lane.b32.xlu0 %v1407_v2, %s1685_s28  ;;  %s1781_s8 = scalar_lea.vmem %s2014_s1, %s1431_s30  ;;  %s1405_s9 = sshll.u32 %s1773_s29, 1  ;;  %vm391_vm1 = vcmp.gt.s32.totalorder %v1792_v19, %v390_v20 }
  0x12   : > { %v1747_v6 = vpack.c.bf16 %v272_v4, %v271_v3  ;;  %v274_v7 = vld [vmem:[%s257_s27 + $0x18] sm:$0xff]  ;;  %s279_s10 = scalar_lea.vmem %s1781_s8, %s1405_s9  ;;  %v392_v24 = vsel %vm391_vm1, 1, %v1686_v18  ;;  %s1805_s16 = scalar_lea.vmem %s2017_s4, %s1431_s30 }
  0x13   : > { %v1750_v8 = vpack.c.bf16 %v274_v7, %v273_v5  ;;  %v280_v13 = vld [vmem:[%s279_s10] sm:$0x3]  ;;  %s402_s17 = scalar_lea.vmem %s1805_s16, %s1405_s9 }
  0x14   : > { %1564 = vmatpush3.bf16.msra.mxu0 %v1747_v6  ;;  %1570 = vmatpush3.bf16.msra.mxu1 %v1747_v6  ;;  %s1822_s21 = scalar_select %p276_p4, 1, 6 }
  0x15   : > { %1565 = vmatprep.subr.bf16.mxu0 %v1682_v0  ;;  %1571 = vmatprep.subr.bf16.mxu1 %v1682_v0  ;;  %s1845_s24 = scalar_select %p276_p4, 2, 5 }
  0x16   : > { %s1408_s22 = sshll.u32 %s1822_s21, 1  ;;  %v508_v44 = vstv %s1822_s21 }
  0x17   : > { %s407_s23 = scalar_lea.vmem %s1781_s8, %s1408_s22  ;;  %vm509_vm5 = vcmp.gt.s32.totalorder %v1792_v19, %v508_v44  ;;  %v629_v61 = vstv %s1845_s24  ;;  %s1411_s25 = sshll.u32 %s1845_s24, 1 }
  0x18   : > { %1567 = vmatpush3.bf16.msra.mxu0 %v1750_v8  ;;  %1573 = vmatpush3.bf16.msra.mxu1 %v1750_v8  ;;  %v408_v39 = vld [vmem:[%s407_s23] sm:$0x3]  ;;  %v510_v45 = vsel %vm509_vm5, 1, %v1686_v18  ;;  %vm630_vm7 = vcmp.gt.s32.totalorder %v1792_v19, %v629_v61  ;;  %s525_s26 = scalar_lea.vmem %s1781_s8, %s1411_s25 }
  0x19   : > { %1574 = vmatprep.subr.bf16.mxu0 %v1682_v0  ;;  %1580 = vmatprep.subr.bf16.mxu1 %v1682_v0  ;;  %v631_v3 = vsel %vm630_vm7, 1, %v1686_v18  ;;  %v526_v4 = vld [vmem:[%s525_s26] sm:$0x3]  ;;  %s1870_s27 = scalar_select %p276_p4, 3, 4 }
  0x1a   : > { %s1894_s6 = scalar_select %p276_p4, 4, 3 }
  0x1b   : > { %1483 = vmatmul.mubr.f32.vlgmr.msra.gmra.mrb[0].mxu0 %v1684_v1  ;;  %s1414_s29 = sshll.u32 %s1870_s27, 1 }
  0x1c   : > { %1576 = vmatpush3.bf16.msra.mxu0 %v1747_v6  ;;  %1504 = vmatprep.mubr.msk.f32.mxu0 %vm1683_vm0, %v1684_v1  ;;  %s646_s30 = scalar_lea.vmem %s1781_s8, %s1414_s29  ;;  %s1417_s7 = sshll.u32 %s1894_s6, 1 }
  0x1d   : > { %1577 = vmatprep.subr.bf16.mxu0 %v1682_v0  ;;  %s767_s9 = scalar_lea.vmem %s1781_s8, %s1417_s7  ;;  %s884_s21 = scalar_lea.vmem %s1805_s16, %s1417_s7 }
  0x1e   : > { %s1918_s10 = scalar_select %p276_p4, 5, 2 }
  0x1f   : > { %s1935_s14 = scalar_select %p276_p4, 6, 1 }
  0x20   : > { %1579 = vmatpush3.bf16.msra.mxu0 %v1750_v8  ;;  %s1420_s11 = sshll.u32 %s1918_s10, 1 }
  0x21   : > { %1586 = vmatprep.subr.bf16.mxu0 %v1682_v0  ;;  %s888_s12 = scalar_lea.vmem %s1781_s8, %s1420_s11  ;;  %s1423_s15 = sshll.u32 %s1935_s14, 1 }
  0x22   : > { %s1952_s23 = scalar_select %p276_p4, 7, 0 }
  0x23   : > { %s1126_s24 = scalar_lea.vmem %s1805_s16, %s1423_s15 }
  0x24   : > { %s1426_s19 = sshll.u32 %s1952_s23, 1 }
  0x25   : > { %s1130_s26 = scalar_lea.vmem %s1781_s8, %s1426_s19 }
  0x83   : > { %v1766_v9 = vpop.permute.xlu0 %367 }
  0xee   : > { %v351_v10 = vpop.f32.mrb[0].mxu0 }
  0xef   : > { %v370_v11 = vadd.f32 %v1766_v9, %v351_v10  ;;  %v1484_v12 = vpop.f32.mrb[1].mxu0  ;;  %v355_v14 = vadd.f32 %v351_v10, %v280_v13 }
  0xf1   : > { %372 = vrot.lane.b32.xlu0 %v370_v11, %s1685_s28  ;;  %v1406_v15 = vmul.f32 -1.442695, %v355_v14 }
  0xf3   : > { %1626 = vpow2.f32 %v1406_v15 }
  0xfd   : > { %v1627_v16 = vpop.eup %1626 }
  0xfe   : > { %v359_v17 = vadd.f32 1.0, %v1627_v16 }
 0x100   : > { %1628 = vrcp.f32 %v359_v17 }
 0x10a   : > { %v1629_v21 = vpop.eup %1628 }
 0x10b   : > { %v382_v28 = vsub.f32 1.0, %v1629_v21  ;;  %v388_v31 = vmul.f32 0.0, %v1629_v21 }
 0x163   : > { %v373_v22 = vpop.permute.xlu0 %372 }
 0x164   : > { %v375_v23 = vmul.f32 %v1629_v21, %v373_v22 }
 0x166   : > { %377 = vrot.lane.b32.xlu1 %v375_v23, %s1685_s28 }
 0x16a   : > { %394 = vperm.xlu1 %1624, %v392_v24  }
 0x1d8   : > { %v378_v25 = vpop.permute.xlu1 %377 }
 0x1d9   : > { %v380_v26 = vadd.f32 %v378_v25, %v280_v13 }
 0x1db   : > { %1630 = vtanh.f32 %v380_v26 }
 0x1e5   : > { %v1631_v27 = vpop.eup %1630 }
 0x1e6   : > { %384 = vrot.lane.b32.xlu0 %v1631_v27, %s1687_s13 }
 0x1e9   : > { %v395_v29 = vpop.permute.xlu1 %394 }
 0x1ea   : > { %vm396_vm2 = vcmp.eq.s32.totalorder %v395_v29, 1  ;;  %v750_v29 = vstv %s1870_s27  ;;  %s1247_s27 = scalar_lea.vmem %s1805_s16, %s1426_s19 }
 0x1eb   : > { %vm751_vm9 = vcmp.gt.s32.totalorder %v1792_v19, %v750_v29 }
 0x258   : > { %v385_v30 = vpop.permute.xlu0 %384 }
 0x259   : > { %v387_v32 = vmul.f32 %v385_v30, %v382_v28 }
 0x25b   : > { %v389_v33 = vadd.f32 %v388_v31, %v387_v32 }
 0x25d   : > { %v397_v34 = vsel %vm396_vm2, %v389_v33, 0.0  ;;  %v752_v33 = vsel %vm751_vm9, 1, %v1686_v18 }
 0x25e   : > { %399 = vrot.lane.b32.xlu1 %v397_v34, %s1687_s13 }
 0x2d0   : > { %v400_v35 = vpop.permute.xlu1 %399 }
 0x2d1   : > { %404 = vst.msk [vmem:[%s402_s17] sm:$0x3] %vm403_vm3, %v400_v35  ;;  %1494 = vmatmul.mubr.msk.f32.vlgmr.msra.gmra.mrb[0].mxu1 %vm281_vm4, %v400_v35  ;;  %s1009_s17 = scalar_lea.vmem %s1781_s8, %s1423_s15  ;;  %s763_s8 = scalar_lea.vmem %s1805_s16, %s1414_s29 }
 0x2d2   : > { %1582 = vmatpush3.bf16.msra.mxu1 %v1747_v6  ;;  %1515 = vmatprep.mubr.msk.f32.mxu1 %vm1683_vm0, %v1684_v1 }
 0x2d3   : > { %1583 = vmatprep.subr.bf16.mxu1 %v1682_v0 }
 0x2d6   : > { %1585 = vmatpush3.bf16.msra.mxu1 %v1750_v8 }
 0x2d7   : > { %1592 = vmatprep.subr.bf16.mxu1 %v1682_v0 }
 0x3a4   : > { %v477_v36 = vpop.f32.mrb[0].mxu1 }
 0x3a5   : > { %v488_v37 = vadd.f32 %v477_v36, %v1766_v9  ;;  %v1495_v38 = vpop.f32.mrb[1].mxu1  ;;  %v481_v40 = vadd.f32 %v477_v36, %v408_v39 }
 0x3a7   : > { %490 = vrot.lane.b32.xlu0 %v488_v37, %s1685_s28  ;;  %v1410_v41 = vmul.f32 -1.442695, %v481_v40 }
 0x3a9   : > { %1632 = vpow2.f32 %v1410_v41 }
 0x3ab   : > { %512 = vperm.xlu0 %1625, %v510_v45  }
 0x3b3   : > { %v1633_v42 = vpop.eup %1632 }
 0x3b4   : > { %v485_v43 = vadd.f32 1.0, %v1633_v42 }
 0x3b6   : > { %1634 = vrcp.f32 %v485_v43 }
 0x3c0   : > { %v1635_v46 = vpop.eup %1634 }
 0x3c1   : > { %v500_v52 = vsub.f32 1.0, %v1635_v46  ;;  %v506_v55 = vmul.f32 %v1635_v46, %v397_v34 }
 0x419   : > { %v491_v47 = vpop.permute.xlu0 %490 }
 0x41a   : > { %v493_v48 = vmul.f32 %v1635_v46, %v491_v47 }
 0x41c   : > { %495 = vrot.lane.b32.xlu1 %v493_v48, %s1685_s28 }
 0x42a   : > { %v513_v53 = vpop.permute.xlu0 %512 }
 0x42b   : > { %vm514_vm6 = vcmp.eq.s32.totalorder %v513_v53, 1 }
 0x48e   : > { %v496_v49 = vpop.permute.xlu1 %495 }
 0x48f   : > { %v498_v50 = vadd.f32 %v496_v49, %v408_v39 }
 0x491   : > { %1636 = vtanh.f32 %v498_v50 }
 0x49b   : > { %v1637_v51 = vpop.eup %1636 }
 0x49c   : > { %502 = vrot.lane.b32.xlu1 %v1637_v51, %s1687_s13 }
 0x50e   : > { %v503_v54 = vpop.permute.xlu1 %502 }
 0x50f   : > { %v505_v56 = vmul.f32 %v503_v54, %v500_v52  ;;  %v871_v54 = vstv %s1894_s6 }
 0x510   : > { %vm872_vm11 = vcmp.gt.s32.totalorder %v1792_v19, %v871_v54 }
 0x511   : > { %v507_v57 = vadd.f32 %v506_v55, %v505_v56 }
 0x513   : > { %v1833_v58 = vsel %vm514_vm6, %v507_v57, 0.0  ;;  %v515_v59 = vsel %vm514_vm6, %v507_v57, %v397_v34  ;;  %v647_v34 = vld [vmem:[%s646_s30] sm:$0x3]  ;;  %s521_s30 = scalar_lea.vmem %s1805_s16, %s1408_s22  ;;  %s1005_s22 = scalar_lea.vmem %s1805_s16, %s1420_s11 }
 0x514   : > { %528 = vrot.lane.b32.xlu1 %v515_v59, %s1687_s13 }
 0x586   : > { %v529_v60 = vpop.permute.xlu1 %528 }
 0x587   : > { %1505 = vmatmul.mubr.msk.f32.vlgmr.msra.gmra.mrb[2].mxu0 %vm281_vm4, %v529_v60  ;;  %v768_v60 = vld [vmem:[%s767_s9] sm:$0x3] }
 0x588   : > { %1588 = vmatpush3.bf16.msra.mxu0 %v1747_v6  ;;  %1526 = vmatprep.mubr.msk.f32.mxu0 %vm1683_vm0, %v1684_v1 }
 0x589   : > { %1589 = vmatprep.subr.bf16.mxu0 %v1682_v0 }
 0x58c   : > { %1591 = vmatpush3.bf16.msra.mxu0 %v1750_v8 }
 0x58d   : > { %1598 = vmatprep.subr.bf16.mxu0 %v1682_v0 }
 0x65a   : > { %v598_v62 = vpop.f32.mrb[2].mxu0 }
 0x65b   : > { %v609_v63 = vadd.f32 %v598_v62, %v1766_v9  ;;  %v1506_v2 = vpop.f32.mrb[3].mxu0  ;;  %v602_v5 = vadd.f32 %v598_v62, %v526_v4 }
 0x65d   : > { %611 = vrot.lane.b32.xlu0 %v609_v63, %s1685_s28  ;;  %v1413_v7 = vmul.f32 -1.442695, %v602_v5 }
 0x65f   : > { %1638 = vpow2.f32 %v1413_v7 }
 0x661   : > { %633 = vperm.xlu0 %1625, %v631_v3  }
 0x669   : > { %v1639_v10 = vpop.eup %1638 }
 0x66a   : > { %v606_v11 = vadd.f32 1.0, %v1639_v10 }
 0x66c   : > { %1640 = vrcp.f32 %v606_v11 }
 0x676   : > { %v1641_v12 = vpop.eup %1640 }
 0x677   : > { %v621_v20 = vsub.f32 1.0, %v1641_v12  ;;  %v627_v23 = vmul.f32 %v1641_v12, %v515_v59 }
 0x6cf   : > { %v612_v13 = vpop.permute.xlu0 %611 }
 0x6d0   : > { %v614_v14 = vmul.f32 %v1641_v12, %v612_v13 }
 0x6d2   : > { %616 = vrot.lane.b32.xlu1 %v614_v14, %s1685_s28 }
 0x6e0   : > { %v634_v22 = vpop.permute.xlu0 %633 }
 0x6e1   : > { %vm635_vm8 = vcmp.eq.s32.totalorder %v634_v22, 1 }
 0x744   : > { %v617_v15 = vpop.permute.xlu1 %616 }
 0x745   : > { %v619_v16 = vadd.f32 %v617_v15, %v526_v4 }
 0x747   : > { %1642 = vtanh.f32 %v619_v16 }
 0x751   : > { %v1643_v17 = vpop.eup %1642 }
 0x752   : > { %623 = vrot.lane.b32.xlu1 %v1643_v17, %s1687_s13 }
 0x7c4   : > { %v624_v21 = vpop.permute.xlu1 %623 }
 0x7c5   : > { %v626_v24 = vmul.f32 %v624_v21, %v621_v20 }
 0x7c7   : > { %v628_v25 = vadd.f32 %v627_v23, %v626_v24  ;;  %v992_v23 = vstv %s1918_s10 }
 0x7c8   : > { %vm993_vm13 = vcmp.gt.s32.totalorder %v1792_v19, %v992_v23 }
 0x7c9   : > { %v636_v26 = vsel %vm635_vm8, %v628_v25, %v515_v59  ;;  %v1858_v27 = vsel %vm635_vm8, %v628_v25, 0.0  ;;  %v873_v59 = vsel %vm872_vm11, 1, %v1686_v18 }
 0x7ca   : > { %649 = vrot.lane.b32.xlu0 %v636_v26, %s1687_s13 }
 0x83c   : > { %v650_v28 = vpop.permute.xlu0 %649 }
 0x83d   : > { %1516 = vmatmul.mubr.msk.f32.vlgmr.msra.gmra.mrb[2].mxu1 %vm281_vm4, %v650_v28 }
 0x83e   : > { %1594 = vmatpush3.bf16.msra.mxu1 %v1747_v6  ;;  %1537 = vmatprep.mubr.msk.f32.mxu1 %vm1683_vm0, %v1684_v1 }
 0x83f   : > { %1595 = vmatprep.subr.bf16.mxu1 %v1682_v0 }
 0x842   : > { %1597 = vmatpush3.bf16.msra.mxu1 %v1750_v8 }
 0x843   : > { %1604 = vmatprep.subr.bf16.mxu1 %v1682_v0 }
 0x910   : > { %v719_v30 = vpop.f32.mrb[2].mxu1 }
 0x911   : > { %v730_v31 = vadd.f32 %v719_v30, %v1766_v9  ;;  %v1517_v32 = vpop.f32.mrb[3].mxu1  ;;  %v723_v35 = vadd.f32 %v719_v30, %v647_v34 }
 0x913   : > { %732 = vrot.lane.b32.xlu1 %v730_v31, %s1685_s28  ;;  %v1416_v36 = vmul.f32 -1.442695, %v723_v35 }
 0x915   : > { %1644 = vpow2.f32 %v1416_v36 }
 0x917   : > { %754 = vperm.xlu1 %1624, %v752_v33  }
 0x91f   : > { %v1645_v37 = vpop.eup %1644 }
 0x920   : > { %v727_v38 = vadd.f32 1.0, %v1645_v37 }
 0x922   : > { %1646 = vrcp.f32 %v727_v38 }
 0x92c   : > { %v1647_v39 = vpop.eup %1646 }
 0x92d   : > { %v742_v45 = vsub.f32 1.0, %v1647_v39  ;;  %v748_v48 = vmul.f32 %v1647_v39, %v636_v26 }
 0x985   : > { %v733_v40 = vpop.permute.xlu1 %732 }
 0x986   : > { %v735_v41 = vmul.f32 %v1647_v39, %v733_v40 }
 0x988   : > { %737 = vrot.lane.b32.xlu0 %v735_v41, %s1685_s28 }
 0x996   : > { %v755_v47 = vpop.permute.xlu1 %754 }
 0x997   : > { %vm756_vm10 = vcmp.eq.s32.totalorder %v755_v47, 1 }
 0x9fa   : > { %v738_v42 = vpop.permute.xlu0 %737 }
 0x9fb   : > { %v740_v43 = vadd.f32 %v738_v42, %v647_v34 }
 0x9fd   : > { %1648 = vtanh.f32 %v740_v43 }
 0xa07   : > { %v1649_v44 = vpop.eup %1648 }
 0xa08   : > { %744 = vrot.lane.b32.xlu0 %v1649_v44, %s1687_s13 }
 0xa7a   : > { %v745_v46 = vpop.permute.xlu0 %744 }
 0xa7b   : > { %v747_v49 = vmul.f32 %v745_v46, %v742_v45  ;;  %v1113_v45 = vstv %s1935_s14 }
 0xa7c   : > { %vm1114_vm15 = vcmp.gt.s32.totalorder %v1792_v19, %v1113_v45 }
 0xa7d   : > { %v749_v50 = vadd.f32 %v748_v48, %v747_v49  ;;  %v1115_v49 = vsel %vm1114_vm15, 1, %v1686_v18 }
 0xa7f   : > { %v757_v51 = vsel %vm756_vm10, %v749_v50, %v636_v26  ;;  %v1883_v52 = vsel %vm756_vm10, %v749_v50, 0.0  ;;  %v1010_v50 = vld [vmem:[%s1009_s17] sm:$0x3] }
 0xa80   : > { %770 = vrot.lane.b32.xlu1 %v757_v51, %s1687_s13 }
 0xaf2   : > { %v771_v53 = vpop.permute.xlu1 %770 }
 0xaf3   : > { %1527 = vmatmul.mubr.msk.f32.vlgmr.msra.gmra.mrb[4].mxu0 %vm281_vm4, %v771_v53 }
 0xaf4   : > { %1600 = vmatpush3.bf16.msra.mxu0 %v1747_v6  ;;  %1548 = vmatprep.mubr.msk.f32.mxu0 %vm1683_vm0, %v1684_v1 }
 0xaf5   : > { %1601 = vmatprep.subr.bf16.mxu0 %v1682_v0 }
 0xaf8   : > { %1603 = vmatpush3.bf16.msra.mxu0 %v1750_v8 }
 0xbc6   : > { %v840_v55 = vpop.f32.mrb[4].mxu0 }
 0xbc7   : > { %v851_v56 = vadd.f32 %v840_v55, %v1766_v9  ;;  %v1528_v57 = vpop.f32.mrb[5].mxu0  ;;  %v844_v61 = vadd.f32 %v840_v55, %v768_v60 }
 0xbc9   : > { %853 = vrot.lane.b32.xlu0 %v851_v56, %s1685_s28  ;;  %v1419_v62 = vmul.f32 -1.442695, %v844_v61 }
 0xbcb   : > { %1650 = vpow2.f32 %v1419_v62 }
 0xbcd   : > { %875 = vperm.xlu0 %1625, %v873_v59  }
 0xbd5   : > { %v1651_v63 = vpop.eup %1650 }
 0xbd6   : > { %v848_v2 = vadd.f32 1.0, %v1651_v63 }
 0xbd8   : > { %1652 = vrcp.f32 %v848_v2 }
 0xbe2   : > { %v1653_v3 = vpop.eup %1652 }
 0xbe3   : > { %v863_v12 = vsub.f32 1.0, %v1653_v3  ;;  %v869_v15 = vmul.f32 %v1653_v3, %v757_v51 }
 0xc3b   : > { %v854_v4 = vpop.permute.xlu0 %853 }
 0xc3c   : > { %v856_v5 = vmul.f32 %v1653_v3, %v854_v4 }
 0xc3e   : > { %858 = vrot.lane.b32.xlu1 %v856_v5, %s1685_s28 }
 0xc4c   : > { %v876_v14 = vpop.permute.xlu0 %875 }
 0xc4d   : > { %vm877_vm12 = vcmp.eq.s32.totalorder %v876_v14, 1 }
 0xcb0   : > { %v859_v7 = vpop.permute.xlu1 %858 }
 0xcb1   : > { %v861_v10 = vadd.f32 %v859_v7, %v768_v60 }
 0xcb3   : > { %1654 = vtanh.f32 %v861_v10 }
 0xcbd   : > { %v1655_v11 = vpop.eup %1654 }
 0xcbe   : > { %865 = vrot.lane.b32.xlu1 %v1655_v11, %s1687_s13 }
 0xd30   : > { %v866_v13 = vpop.permute.xlu1 %865 }
 0xd31   : > { %v868_v16 = vmul.f32 %v866_v13, %v863_v12  ;;  %v1234_v13 = vstv %s1952_s23 }
 0xd32   : > { %vm1235_vm1 = vcmp.gt.s32.totalorder %v1792_v19, %v1234_v13 }
 0xd33   : > { %v870_v17 = vadd.f32 %v869_v15, %v868_v16 }
 0xd35   : > { %v878_v20 = vsel %vm877_vm12, %v870_v17, %v757_v51  ;;  %v1907_v21 = vsel %vm877_vm12, %v870_v17, 0.0  ;;  %v1236_v17 = vsel %vm1235_vm1, 1, %v1686_v18 }
 0xd36   : > { %891 = vrot.lane.b32.xlu0 %v878_v20, %s1687_s13 }
 0xda8   : > { %v892_v22 = vpop.permute.xlu0 %891 }
 0xda9   : > { %1538 = vmatmul.mubr.msk.f32.vlgmr.msra.gmra.mrb[4].mxu1 %vm281_vm4, %v892_v22 }
 0xdaa   : > { %1606 = vmatpush3.bf16.msra.mxu1 %v1747_v6  ;;  %1559 = vmatprep.mubr.msk.f32.mxu1 %vm1683_vm0, %v1684_v1  ;;  %v994_v1 = vsel %vm993_vm13, 1, %v1686_v18 }
 0xdab   : > { %1607 = vmatprep.subr.bf16.mxu1 %v1682_v0  ;;  %v889_v0 = vld [vmem:[%s888_s12] sm:$0x3] }
 0xdae   : > { %1609 = vmatpush3.bf16.msra.mxu1 %v1750_v8 }
 0xe7c   : > { %v961_v24 = vpop.f32.mrb[4].mxu1 }
 0xe7d   : > { %v972_v25 = vadd.f32 %v961_v24, %v1766_v9  ;;  %v1539_v26 = vpop.f32.mrb[5].mxu1  ;;  %v965_v6 = vadd.f32 %v961_v24, %v889_v0 }
 0xe7f   : > { %974 = vrot.lane.b32.xlu1 %v972_v25, %s1685_s28  ;;  %v1422_v8 = vmul.f32 -1.442695, %v965_v6 }
 0xe81   : > { %1656 = vpow2.f32 %v1422_v8 }
 0xe83   : > { %996 = vperm.xlu1 %1624, %v994_v1  }
 0xe8b   : > { %v1657_v28 = vpop.eup %1656 }
 0xe8c   : > { %v969_v29 = vadd.f32 1.0, %v1657_v28 }
 0xe8e   : > { %1658 = vrcp.f32 %v969_v29 }
 0xe98   : > { %v1659_v30 = vpop.eup %1658 }
 0xe99   : > { %v984_v36 = vsub.f32 1.0, %v1659_v30  ;;  %v990_v39 = vmul.f32 %v1659_v30, %v878_v20 }
 0xef1   : > { %v975_v31 = vpop.permute.xlu1 %974 }
 0xef2   : > { %v977_v32 = vmul.f32 %v1659_v30, %v975_v31 }
 0xef4   : > { %979 = vrot.lane.b32.xlu0 %v977_v32, %s1685_s28 }
 0xf02   : > { %v997_v38 = vpop.permute.xlu1 %996 }
 0xf03   : > { %vm998_vm14 = vcmp.eq.s32.totalorder %v997_v38, 1 }
 0xf66   : > { %v980_v33 = vpop.permute.xlu0 %979 }
 0xf67   : > { %v982_v34 = vadd.f32 %v980_v33, %v889_v0 }
 0xf69   : > { %1660 = vtanh.f32 %v982_v34 }
 0xf73   : > { %v1661_v35 = vpop.eup %1660 }
 0xf74   : > { %986 = vrot.lane.b32.xlu0 %v1661_v35, %s1687_s13 }
 0xfe6   : > { %v987_v37 = vpop.permute.xlu0 %986 }
 0xfe7   : > { %v989_v40 = vmul.f32 %v987_v37, %v984_v36 }
 0xfe9   : > { %v991_v41 = vadd.f32 %v990_v39, %v989_v40 }
 0xfeb   : > { %v999_v42 = vsel %vm998_vm14, %v991_v41, %v878_v20  ;;  %v1000_v43 = vsel %vm998_vm14, %v991_v41, 0.0 }
 0xfec   : > { %1012 = vrot.lane.b32.xlu1 %v999_v42, %s1687_s13 }
0x105e   : > { %v1013_v44 = vpop.permute.xlu1 %1012 }
0x105f   : > { %1549 = vmatmul.mubr.msk.f32.vlgmr.msra.gmra.mrb[6].mxu0 %vm281_vm4, %v1013_v44 }
0x1132   : > { %v1082_v46 = vpop.f32.mrb[6].mxu0 }
0x1133   : > { %v1093_v47 = vadd.f32 %v1082_v46, %v1766_v9  ;;  %v1550_v48 = vpop.f32.mrb[7].mxu0  ;;  %v1086_v51 = vadd.f32 %v1082_v46, %v1010_v50 }
0x1135   : > { %1095 = vrot.lane.b32.xlu0 %v1093_v47, %s1685_s28  ;;  %v1425_v53 = vmul.f32 -1.442695, %v1086_v51 }
0x1137   : > { %1662 = vpow2.f32 %v1425_v53 }
0x1139   : > { %1117 = vperm.xlu0 %1625, %v1115_v49  }
0x1141   : > { %v1663_v54 = vpop.eup %1662 }
0x1142   : > { %v1090_v55 = vadd.f32 1.0, %v1663_v54 }
0x1144   : > { %1664 = vrcp.f32 %v1090_v55 }
0x114e   : > { %v1665_v56 = vpop.eup %1664 }
0x114f   : > { %v1105_v63 = vsub.f32 1.0, %v1665_v56  ;;  %v1111_v4 = vmul.f32 %v1665_v56, %v999_v42 }
0x11a7   : > { %v1096_v57 = vpop.permute.xlu0 %1095 }
0x11a8   : > { %v1098_v59 = vmul.f32 %v1665_v56, %v1096_v57 }
0x11aa   : > { %1100 = vrot.lane.b32.xlu1 %v1098_v59, %s1685_s28 }
0x11b8   : > { %v1118_v3 = vpop.permute.xlu0 %1117 }
0x11b9   : > { %vm1119_vm0 = vcmp.eq.s32.totalorder %v1118_v3, 1 }
0x121c   : > { %v1101_v60 = vpop.permute.xlu1 %1100 }
0x121d   : > { %v1103_v61 = vadd.f32 %v1101_v60, %v1010_v50 }
0x121f   : > { %1666 = vtanh.f32 %v1103_v61 }
0x1229   : > { %v1667_v62 = vpop.eup %1666 }
0x122a   : > { %1107 = vrot.lane.b32.xlu1 %v1667_v62, %s1687_s13 }
0x129c   : > { %v1108_v2 = vpop.permute.xlu1 %1107 }
0x129d   : > { %v1110_v5 = vmul.f32 %v1108_v2, %v1105_v63 }
0x129f   : > { %v1112_v7 = vadd.f32 %v1111_v4, %v1110_v5 }
0x12a1   : > { %v1120_v10 = vsel %vm1119_vm0, %v1112_v7, %v999_v42  ;;  %v1121_v11 = vsel %vm1119_vm0, %v1112_v7, 0.0 }
0x12a2   : > { %1133 = vrot.lane.b32.xlu0 %v1120_v10, %s1687_s13 }
0x1314   : > { %v1134_v12 = vpop.permute.xlu0 %1133 }
0x1315   : > { %1560 = vmatmul.mubr.msk.f32.vlgmr.msra.gmra.mrb[6].mxu1 %vm281_vm4, %v1134_v12 }
0x13e8   : > { %v1203_v14 = vpop.f32.mrb[6].mxu1 }
0x13e9   : > { %v1214_v15 = vadd.f32 %v1203_v14, %v1766_v9  ;;  %v1561_v16 = vpop.f32.mrb[7].mxu1  ;;  %v1131_v9 = vld [vmem:[%s1130_s26] sm:$0x3] }
0x13ea   : > { %v1207_v19 = vadd.f32 %v1203_v14, %v1131_v9 }
0x13eb   : > { %1216 = vrot.lane.b32.xlu1 %v1214_v15, %s1685_s28 }
0x13ec   : > { %v1428_v20 = vmul.f32 -1.442695, %v1207_v19 }
0x13ee   : > { %1668 = vpow2.f32 %v1428_v20 }
0x13ef   : > { %1238 = vperm.xlu1 %1624, %v1236_v17  }
0x13f3   : > { %518 = vrot.lane.b32.xlu1 %v1833_v58, %s1687_s13 }
0x13f7   : > { %760 = vrot.lane.b32.xlu1 %v1883_v52, %s1687_s13 }
0x13f8   : > { %v1669_v22 = vpop.eup %1668 }
0x13f9   : > { %v1211_v18 = vadd.f32 1.0, %v1669_v22 }
0x13fb   : > { %1002 = vrot.lane.b32.xlu1 %v1000_v43, %s1687_s13  ;;  %1670 = vrcp.f32 %v1211_v18 }
0x1405   : > { %v1671_v23 = vpop.eup %1670 }
0x1406   : > { %v1226_v6 = vsub.f32 1.0, %v1671_v23  ;;  %v1232_v28 = vmul.f32 %v1671_v23, %v1120_v10 }
0x145d   : > { %v1217_v24 = vpop.permute.xlu1 %1216 }
0x145e   : > { %v1219_v58 = vmul.f32 %v1671_v23, %v1217_v24 }
0x1460   : > { %1221 = vrot.lane.b32.xlu0 %v1219_v58, %s1685_s28  ;;  %s642_s28 = scalar_lea.vmem %s1805_s16, %s1411_s25  ;;  %s1404_s25 = sshll.u32 %s1733_s20, 1 }
0x146e   : > { %v1239_v52 = vpop.permute.xlu1 %1238 }
0x146f   : > { %vm1240_vm2 = vcmp.eq.s32.totalorder %v1239_v52, 1 }
0x1472   : > { %v519_v25 = vpop.permute.xlu1 %518 }
0x1473   : > { %522 = vst.msk [vmem:[%s521_s30] sm:$0x3] %vm403_vm3, %v519_v25 }
0x14d2   : > { %v1222_v26 = vpop.permute.xlu0 %1221 }
0x14d3   : > { %v1224_v1 = vadd.f32 %v1222_v26, %v1131_v9 }
0x14d5   : > { %1672 = vtanh.f32 %v1224_v1 }
0x14df   : > { %v1673_v0 = vpop.eup %1672 }
0x14e0   : > { %1228 = vrot.lane.b32.xlu0 %v1673_v0, %s1687_s13 }
0x14e4   : > { %639 = vrot.lane.b32.xlu0 %v1858_v27, %s1687_s13  ;;  %v761_v27 = vpop.permute.xlu1 %760 }
0x14e8   : > { %881 = vrot.lane.b32.xlu0 %v1907_v21, %s1687_s13  ;;  %v1003_v34 = vpop.permute.xlu1 %1002 }
0x14ec   : > { %1123 = vrot.lane.b32.xlu0 %v1121_v11, %s1687_s13 }
0x1552   : > { %v1229_v8 = vpop.permute.xlu0 %1228 }
0x1553   : > { %v1231_v29 = vmul.f32 %v1229_v8, %v1226_v6 }
0x1555   : > { %v1233_v30 = vadd.f32 %v1232_v28, %v1231_v29 }
0x1556   : > { %v640_v31 = vpop.permute.xlu0 %639 }
0x1557   : > { %643 = vst.msk [vmem:[%s642_s28] sm:$0x3] %vm403_vm3, %v640_v31  ;;  %v1242_v21 = vsel %vm1240_vm2, %v1233_v30, 0.0  ;;  %v1241_v32 = vsel %vm1240_vm2, %v1233_v30, %v1120_v10 }
0x1558   : > { %764 = vst.msk [vmem:[%s763_s8] sm:$0x3] %vm403_vm3, %v761_v27  ;;  %1244 = vrot.lane.b32.xlu1 %v1242_v21, %s1687_s13  ;;  %1250 = vrot.lane.b32.xlu0 %v1241_v32, %s1687_s13  ;;  %s269_s13 = scalar_lea.vmem %s2018_s5, %s1404_s25 }
0x155a   : > { %v882_v33 = vpop.permute.xlu0 %881 }
0x155b   : > { %885 = vst.msk [vmem:[%s884_s21] sm:$0x3] %vm403_vm3, %v882_v33 }
0x155c   : > { %1006 = vst.msk [vmem:[%s1005_s22] sm:$0x3] %vm403_vm3, %v1003_v34 }
0x155e   : > { %v1124_v35 = vpop.permute.xlu0 %1123 }
0x155f   : > { %1127 = vst.msk [vmem:[%s1126_s24] sm:$0x3] %vm403_vm3, %v1124_v35 }
0x15ca   : > { %v1245_v36 = vpop.permute.xlu1 %1244  ;;  %v1251_v37 = vpop.permute.xlu0 %1250 }
0x15cb   : > { %1248 = vst.msk [vmem:[%s1247_s27] sm:$0x3] %vm403_vm3, %v1245_v36  ;;  %1253 = vst.msk [vmem:[%s269_s13] sm:$0x3] %vm403_vm3, %v1251_v37 }
0x15cc PF: > { %s16_s18 = sadd.s32 1, %s1680_s18  }
0x15cd   : > { %p13_p5 = scmp.ge.s32.totalorder %s16_s18, 4  }
0x15cf   :  { %15 = sbr.rel (!%p13_p5) target bundleno = 1 (0x1), region = 100 }

</bundles_post_ra>
